<compile_context>
chip_gen: v7x
topology: tpu7x:2x2x1
jax: 0.10.0
libtpu: 0.0.40
codegen_flags: <defaults>
</compile_context>

<pallas_src>
import functools

import jax
import jax.numpy as jnp
from jax.experimental import pallas as pl
from jax.experimental.pallas import tpu as pltpu


def tsne_part_kernel(x_row_ref, xt_col_ref, out_ref, acc_ref):
    c = pl.program_id(1)
    tr, n_dim = x_row_ref.shape
    tc = xt_col_ref.shape[1]

    @pl.when(c == 0)
    def _():
        acc_ref[...] = jnp.zeros_like(acc_ref)

    # Column-side values for this tile, loaded once per grid step: (D, TC),
    # lane-dense, a handful of vregs.
    col = xt_col_ref[...]

    # Small resident accumulator, SSA-carried across the 8-row chunk loop so the
    # scratch is read/written exactly once per grid step.
    acc = acc_ref[...]                                    # (8, TC)
    for s in range(0, tr, 8):                             # static unrolled chunks
        rows = x_row_ref[s:s + 8, :]                      # (8, D) — one vreg load
        diff = rows[:, 0:1] - col[0:1, :]                 # (8, TC) broadcast sub
        d2 = diff * diff
        for d in range(1, n_dim):
            diff = rows[:, d:d + 1] - col[d:d + 1, :]
            d2 = d2 + diff * diff
        d2 = d2 + 1.0                                     # 1 + dkl2
        # EUP approx reciprocal + one Newton-Raphson step (~f32 accurate).
        r0 = pl.reciprocal(d2, approx=True)
        acc = acc + r0 * (2.0 - d2 * r0)
    acc_ref[...] = acc

    # Last column step of this row tile: fold lane groups to a lane-dense
    # (8, 128) output block with plain VPU adds (no XLU reduce).
    @pl.when(c == pl.num_programs(1) - 1)
    def _():
        a = acc_ref[...]
        red = a[:, 0:128]
        for l in range(128, tc, 128):
            red = red + a[:, l:l + 128]
        out_ref[...] = red


def _round_up(x, m):
    return ((x + m - 1) // m) * m


def tsne_loss_pallas(weight, pij, i, j, *, tile_rows=256, tile_cols=1024):
    """weight: (N, D) f32, pij: (B,) f32, i/j: (B,) int32 -> scalar f32 loss."""
    weight = weight.astype(jnp.float32)
    n_points, n_dim = weight.shape

    # Tile sizes: rows multiple of 8, cols multiple of 128, clamped to padded N.
    tr = min(_round_up(max(tile_rows, 8), 8), _round_up(n_points, 8))
    tc = min(_round_up(max(tile_cols, 128), 128), _round_up(n_points, 128))

    n_rows = _round_up(n_points, tr)
    n_cols = _round_up(n_points, tc)
    n_row_tiles = n_rows // tr
    n_col_tiles = n_cols // tc

    # Pad-to-tile: padded rows get +PAD, padded cols get -PAD, so every pair
    # involving padding has a huge-but-finite distance -> 1/(1+d^2) ~ 1e-31
    # (negligible, and never inf/NaN through the Newton step).
    PAD = 1e15
    x_rows = jnp.pad(weight, ((0, n_rows - n_points), (0, 0)),
                     constant_values=PAD)                        # (n_rows, D)
    x_cols_t = jnp.pad(weight, ((0, n_cols - n_points), (0, 0)),
                       constant_values=-PAD).T                   # (D, n_cols)

    partials = pl.pallas_call(
        tsne_part_kernel,
        out_shape=jax.ShapeDtypeStruct((n_row_tiles * 8, 128), jnp.float32),
        grid_spec=pltpu.PrefetchScalarGridSpec(
            num_scalar_prefetch=0,
            grid=(n_row_tiles, n_col_tiles),
            in_specs=[
                pl.BlockSpec((tr, n_dim), lambda r, c: (r, 0)),   # row tile of x
                pl.BlockSpec((n_dim, tc), lambda r, c: (0, c)),   # col tile of x^T
            ],
            out_specs=pl.BlockSpec((8, 128), lambda r, c: (r, 0)),
            scratch_shapes=[pltpu.VMEM((8, tc), jnp.float32)],
        ),
        compiler_params=pltpu.CompilerParams(
            dimension_semantics=("parallel", "arbitrary"),
        ),
    )(x_rows, x_cols_t)

    # part = sum_{k,l} 1/(1 + dkl2) - N   (diagonal terms are each exactly 1;
    # padding contributes ~1e-31 per term, far below f32 resolution of part).
    part = jnp.sum(partials) - jnp.float32(n_points)

    # Pair-KL epilogue (B is tiny; plain XLA, matches the PyTorch module exactly,
    # including the (1 + diff^2).sum() == D + ||diff||^2 denominator).
    xi = weight[i]
    xj = weight[j]
    diff = xi - xj
    num = 1.0 / jnp.sum(1.0 + diff * diff, axis=1)
    qij = num / part
    return jnp.sum(pij * (jnp.log(pij) - jnp.log(qij)))


def tsne_loss_ref(weight, pij, i, j):
    diff = weight[:, None, :] - weight[None, :, :]
    dkl2 = jnp.sum(diff ** 2, axis=2)
    n = dkl2.shape[0]
    part = jnp.sum(1.0 / (1.0 + dkl2)) - n
    xi = weight[i]
    xj = weight[j]
    num = 1.0 / jnp.sum(1.0 + (xi - xj) ** 2, axis=1)
    qij = num / part
    return jnp.sum(pij * (jnp.log(pij) - jnp.log(qij)))


if __name__ == "__main__":
    # n_points deliberately NOT a multiple of 8 to exercise the pad-to-tile path.
    n_points, n_dim, n_pairs = 500, 4, 256

    key = jax.random.PRNGKey(0)
    k_w, k_p, k_i, k_j = jax.random.split(key, 4)

    # nn.Embedding default init: weight ~ N(0, 1)
    weight = jax.random.normal(k_w, (n_points, n_dim), dtype=jnp.float32)
    # pij: positive probabilities
    pij = jax.nn.softmax(jax.random.normal(k_p, (n_pairs,), dtype=jnp.float32))
    i = jax.random.randint(k_i, (n_pairs,), 0, n_points, dtype=jnp.int32)
    j = jax.random.randint(k_j, (n_pairs,), 0, n_points, dtype=jnp.int32)

    # Small tiles so the demo exercises both grid axes (4 row x 2 col tiles).
    fn = jax.jit(functools.partial(tsne_loss_pallas, tile_rows=128, tile_cols=256))
    loss = jax.block_until_ready(fn(weight, pij, i, j))

    loss_ref = tsne_loss_ref(weight, pij, i, j)
    assert jnp.allclose(loss, loss_ref, rtol=1e-4, atol=1e-4), (loss, loss_ref)

    print("KERNEL_OK")
</pallas_src>

<mosaic_0001>
module attributes {stable_mosaic.version = 11 : i64} {
  func.func @tsne_part_kernel(%arg0: i32, %arg1: i32, %arg2: memref<128x4xf32, #tpu.memory_space<vmem>>, %arg3: memref<4x256xf32, #tpu.memory_space<vmem>>, %arg4: memref<8x128xf32, #tpu.memory_space<vmem>>, %arg5: memref<8x256xf32, #tpu.memory_space<vmem>>) attributes {dimension_semantics = [#tpu.dimension_semantics<parallel>, #tpu.dimension_semantics<arbitrary>], iteration_bounds = array<i64: 4, 2>, scalar_prefetch = 0 : i64, scratch_operands = 1 : i64, tpu.core_type = #tpu.core_type<tc>, window_params = [{transform_indices = @transform_0, window_bounds = array<i64: 128, 4>}, {transform_indices = @transform_1, window_bounds = array<i64: 4, 256>}, {transform_indices = @transform_2, window_bounds = array<i64: 8, 128>}]} {
    %c0_i32 = arith.constant 0 : i32
    %0 = arith.cmpi eq, %arg1, %c0_i32 : i32
    %1 = arith.extui %0 : i1 to i32
    %c0_i32_0 = arith.constant 0 : i32
    %2 = arith.cmpi ne, %1, %c0_i32_0 : i32
    scf.if %2 {
      %cst_55 = arith.constant 0.000000e+00 : f32
      %585 = vector.broadcast %cst_55 : f32 to vector<8x256xf32>
      %c0_56 = arith.constant 0 : index
      %c0_57 = arith.constant 0 : index
      %586 = vector.load %arg5[%c0_56, %c0_57] : memref<8x256xf32, #tpu.memory_space<vmem>>, vector<8x256xf32>
      tpu.vector_store %arg5[%c0_56, %c0_57], %585 {strides = array<i32>} : memref<8x256xf32, #tpu.memory_space<vmem>>, vector<8x256xf32>,
    } else {
    }
    %c0 = arith.constant 0 : index
    %c0_1 = arith.constant 0 : index
    %3 = vector.load %arg3[%c0, %c0_1] : memref<4x256xf32, #tpu.memory_space<vmem>>, vector<4x256xf32>
    %c0_2 = arith.constant 0 : index
    %c0_3 = arith.constant 0 : index
    %4 = vector.load %arg5[%c0_2, %c0_3] : memref<8x256xf32, #tpu.memory_space<vmem>>, vector<8x256xf32>
    %c0_4 = arith.constant 0 : index
    %c0_5 = arith.constant 0 : index
    %5 = vector.load %arg2[%c0_4, %c0_5] : memref<128x4xf32, #tpu.memory_space<vmem>>, vector<8x4xf32>
    %6 = vector.extract_strided_slice %5 {offsets = [0, 0], sizes = [8, 1], strides = [1, 1]} : vector<8x4xf32> to vector<8x1xf32>
    %7 = vector.extract_strided_slice %3 {offsets = [0, 0], sizes = [1, 256], strides = [1, 1]} : vector<4x256xf32> to vector<1x256xf32>
    %8 = vector.broadcast %6 : vector<8x1xf32> to vector<8x256xf32>
    %9 = vector.broadcast %7 : vector<1x256xf32> to vector<8x256xf32>
    %10 = arith.subf %8, %9 : vector<8x256xf32>
    %11 = arith.mulf %10, %10 : vector<8x256xf32>
    %12 = vector.extract_strided_slice %5 {offsets = [0, 1], sizes = [8, 1], strides = [1, 1]} : vector<8x4xf32> to vector<8x1xf32>
    %13 = vector.extract_strided_slice %3 {offsets = [1, 0], sizes = [1, 256], strides = [1, 1]} : vector<4x256xf32> to vector<1x256xf32>
    %14 = vector.broadcast %12 : vector<8x1xf32> to vector<8x256xf32>
    %15 = vector.broadcast %13 : vector<1x256xf32> to vector<8x256xf32>
    %16 = arith.subf %14, %15 : vector<8x256xf32>
    %17 = arith.mulf %16, %16 : vector<8x256xf32>
    %18 = arith.addf %11, %17 : vector<8x256xf32>
    %19 = vector.extract_strided_slice %5 {offsets = [0, 2], sizes = [8, 1], strides = [1, 1]} : vector<8x4xf32> to vector<8x1xf32>
    %20 = vector.extract_strided_slice %3 {offsets = [2, 0], sizes = [1, 256], strides = [1, 1]} : vector<4x256xf32> to vector<1x256xf32>
    %21 = vector.broadcast %19 : vector<8x1xf32> to vector<8x256xf32>
    %22 = vector.broadcast %20 : vector<1x256xf32> to vector<8x256xf32>
    %23 = arith.subf %21, %22 : vector<8x256xf32>
    %24 = arith.mulf %23, %23 : vector<8x256xf32>
    %25 = arith.addf %18, %24 : vector<8x256xf32>
    %26 = vector.extract_strided_slice %5 {offsets = [0, 3], sizes = [8, 1], strides = [1, 1]} : vector<8x4xf32> to vector<8x1xf32>
    %27 = vector.extract_strided_slice %3 {offsets = [3, 0], sizes = [1, 256], strides = [1, 1]} : vector<4x256xf32> to vector<1x256xf32>
    %28 = vector.broadcast %26 : vector<8x1xf32> to vector<8x256xf32>
    %29 = vector.broadcast %27 : vector<1x256xf32> to vector<8x256xf32>
    %30 = arith.subf %28, %29 : vector<8x256xf32>
    %31 = arith.mulf %30, %30 : vector<8x256xf32>
    %32 = arith.addf %25, %31 : vector<8x256xf32>
    %cst = arith.constant 1.000000e+00 : f32
    %33 = vector.broadcast %cst : f32 to vector<8x256xf32>
    %34 = arith.addf %32, %33 : vector<8x256xf32>
    %35 = tpu.reciprocal %34 {approx = true} : vector<8x256xf32> -> vector<8x256xf32>
    %36 = arith.mulf %34, %35 : vector<8x256xf32>
    %cst_6 = arith.constant 2.000000e+00 : f32
    %37 = vector.broadcast %cst_6 : f32 to vector<8x256xf32>
    %38 = arith.subf %37, %36 : vector<8x256xf32>
    %39 = arith.mulf %35, %38 : vector<8x256xf32>
    %40 = arith.addf %4, %39 : vector<8x256xf32>
    %c8 = arith.constant 8 : index
    %c0_7 = arith.constant 0 : index
    %41 = vector.load %arg2[%c8, %c0_7] : memref<128x4xf32, #tpu.memory_space<vmem>>, vector<8x4xf32>
    %42 = vector.extract_strided_slice %41 {offsets = [0, 0], sizes = [8, 1], strides = [1, 1]} : vector<8x4xf32> to vector<8x1xf32>
    %43 = vector.extract_strided_slice %3 {offsets = [0, 0], sizes = [1, 256], strides = [1, 1]} : vector<4x256xf32> to vector<1x256xf32>
    %44 = vector.broadcast %42 : vector<8x1xf32> to vector<8x256xf32>
    %45 = vector.broadcast %43 : vector<1x256xf32> to vector<8x256xf32>
    %46 = arith.subf %44, %45 : vector<8x256xf32>
    %47 = arith.mulf %46, %46 : vector<8x256xf32>
    %48 = vector.extract_strided_slice %41 {offsets = [0, 1], sizes = [8, 1], strides = [1, 1]} : vector<8x4xf32> to vector<8x1xf32>
    %49 = vector.extract_strided_slice %3 {offsets = [1, 0], sizes = [1, 256], strides = [1, 1]} : vector<4x256xf32> to vector<1x256xf32>
    %50 = vector.broadcast %48 : vector<8x1xf32> to vector<8x256xf32>
    %51 = vector.broadcast %49 : vector<1x256xf32> to vector<8x256xf32>
    %52 = arith.subf %50, %51 : vector<8x256xf32>
    %53 = arith.mulf %52, %52 : vector<8x256xf32>
    %54 = arith.addf %47, %53 : vector<8x256xf32>
    %55 = vector.extract_strided_slice %41 {offsets = [0, 2], sizes = [8, 1], strides = [1, 1]} : vector<8x4xf32> to vector<8x1xf32>
    %56 = vector.extract_strided_slice %3 {offsets = [2, 0], sizes = [1, 256], strides = [1, 1]} : vector<4x256xf32> to vector<1x256xf32>
    %57 = vector.broadcast %55 : vector<8x1xf32> to vector<8x256xf32>
    %58 = vector.broadcast %56 : vector<1x256xf32> to vector<8x256xf32>
    %59 = arith.subf %57, %58 : vector<8x256xf32>
    %60 = arith.mulf %59, %59 : vector<8x256xf32>
    %61 = arith.addf %54, %60 : vector<8x256xf32>
    %62 = vector.extract_strided_slice %41 {offsets = [0, 3], sizes = [8, 1], strides = [1, 1]} : vector<8x4xf32> to vector<8x1xf32>
    %63 = vector.extract_strided_slice %3 {offsets = [3, 0], sizes = [1, 256], strides = [1, 1]} : vector<4x256xf32> to vector<1x256xf32>
    %64 = vector.broadcast %62 : vector<8x1xf32> to vector<8x256xf32>
    %65 = vector.broadcast %63 : vector<1x256xf32> to vector<8x256xf32>
    %66 = arith.subf %64, %65 : vector<8x256xf32>
    %67 = arith.mulf %66, %66 : vector<8x256xf32>
    %68 = arith.addf %61, %67 : vector<8x256xf32>
    %cst_8 = arith.constant 1.000000e+00 : f32
    %69 = vector.broadcast %cst_8 : f32 to vector<8x256xf32>
    %70 = arith.addf %68, %69 : vector<8x256xf32>
    %71 = tpu.reciprocal %70 {approx = true} : vector<8x256xf32> -> vector<8x256xf32>
    %72 = arith.mulf %70, %71 : vector<8x256xf32>
    %cst_9 = arith.constant 2.000000e+00 : f32
    %73 = vector.broadcast %cst_9 : f32 to vector<8x256xf32>
    %74 = arith.subf %73, %72 : vector<8x256xf32>
    %75 = arith.mulf %71, %74 : vector<8x256xf32>
    %76 = arith.addf %40, %75 : vector<8x256xf32>
    %c16 = arith.constant 16 : index
    %c0_10 = arith.constant 0 : index
    %77 = vector.load %arg2[%c16, %c0_10] : memref<128x4xf32, #tpu.memory_space<vmem>>, vector<8x4xf32>
    %78 = vector.extract_strided_slice %77 {offsets = [0, 0], sizes = [8, 1], strides = [1, 1]} : vector<8x4xf32> to vector<8x1xf32>
    %79 = vector.extract_strided_slice %3 {offsets = [0, 0], sizes = [1, 256], strides = [1, 1]} : vector<4x256xf32> to vector<1x256xf32>
    %80 = vector.broadcast %78 : vector<8x1xf32> to vector<8x256xf32>
    %81 = vector.broadcast %79 : vector<1x256xf32> to vector<8x256xf32>
    %82 = arith.subf %80, %81 : vector<8x256xf32>
    %83 = arith.mulf %82, %82 : vector<8x256xf32>
    %84 = vector.extract_strided_slice %77 {offsets = [0, 1], sizes = [8, 1], strides = [1, 1]} : vector<8x4xf32> to vector<8x1xf32>
    %85 = vector.extract_strided_slice %3 {offsets = [1, 0], sizes = [1, 256], strides = [1, 1]} : vector<4x256xf32> to vector<1x256xf32>
    %86 = vector.broadcast %84 : vector<8x1xf32> to vector<8x256xf32>
    %87 = vector.broadcast %85 : vector<1x256xf32> to vector<8x256xf32>
    %88 = arith.subf %86, %87 : vector<8x256xf32>
    %89 = arith.mulf %88, %88 : vector<8x256xf32>
    %90 = arith.addf %83, %89 : vector<8x256xf32>
    %91 = vector.extract_strided_slice %77 {offsets = [0, 2], sizes = [8, 1], strides = [1, 1]} : vector<8x4xf32> to vector<8x1xf32>
    %92 = vector.extract_strided_slice %3 {offsets = [2, 0], sizes = [1, 256], strides = [1, 1]} : vector<4x256xf32> to vector<1x256xf32>
    %93 = vector.broadcast %91 : vector<8x1xf32> to vector<8x256xf32>
    %94 = vector.broadcast %92 : vector<1x256xf32> to vector<8x256xf32>
    %95 = arith.subf %93, %94 : vector<8x256xf32>
    %96 = arith.mulf %95, %95 : vector<8x256xf32>
    %97 = arith.addf %90, %96 : vector<8x256xf32>
    %98 = vector.extract_strided_slice %77 {offsets = [0, 3], sizes = [8, 1], strides = [1, 1]} : vector<8x4xf32> to vector<8x1xf32>
    %99 = vector.extract_strided_slice %3 {offsets = [3, 0], sizes = [1, 256], strides = [1, 1]} : vector<4x256xf32> to vector<1x256xf32>
    %100 = vector.broadcast %98 : vector<8x1xf32> to vector<8x256xf32>
    %101 = vector.broadcast %99 : vector<1x256xf32> to vector<8x256xf32>
    %102 = arith.subf %100, %101 : vector<8x256xf32>
    %103 = arith.mulf %102, %102 : vector<8x256xf32>
    %104 = arith.addf %97, %103 : vector<8x256xf32>
    %cst_11 = arith.constant 1.000000e+00 : f32
    %105 = vector.broadcast %cst_11 : f32 to vector<8x256xf32>
    %106 = arith.addf %104, %105 : vector<8x256xf32>
    %107 = tpu.reciprocal %106 {approx = true} : vector<8x256xf32> -> vector<8x256xf32>
    %108 = arith.mulf %106, %107 : vector<8x256xf32>
    %cst_12 = arith.constant 2.000000e+00 : f32
    %109 = vector.broadcast %cst_12 : f32 to vector<8x256xf32>
    %110 = arith.subf %109, %108 : vector<8x256xf32>
    %111 = arith.mulf %107, %110 : vector<8x256xf32>
    %112 = arith.addf %76, %111 : vector<8x256xf32>
    %c24 = arith.constant 24 : index
    %c0_13 = arith.constant 0 : index
    %113 = vector.load %arg2[%c24, %c0_13] : memref<128x4xf32, #tpu.memory_space<vmem>>, vector<8x4xf32>
    %114 = vector.extract_strided_slice %113 {offsets = [0, 0], sizes = [8, 1], strides = [1, 1]} : vector<8x4xf32> to vector<8x1xf32>
    %115 = vector.extract_strided_slice %3 {offsets = [0, 0], sizes = [1, 256], strides = [1, 1]} : vector<4x256xf32> to vector<1x256xf32>
    %116 = vector.broadcast %114 : vector<8x1xf32> to vector<8x256xf32>
    %117 = vector.broadcast %115 : vector<1x256xf32> to vector<8x256xf32>
    %118 = arith.subf %116, %117 : vector<8x256xf32>
    %119 = arith.mulf %118, %118 : vector<8x256xf32>
    %120 = vector.extract_strided_slice %113 {offsets = [0, 1], sizes = [8, 1], strides = [1, 1]} : vector<8x4xf32> to vector<8x1xf32>
    %121 = vector.extract_strided_slice %3 {offsets = [1, 0], sizes = [1, 256], strides = [1, 1]} : vector<4x256xf32> to vector<1x256xf32>
    %122 = vector.broadcast %120 : vector<8x1xf32> to vector<8x256xf32>
    %123 = vector.broadcast %121 : vector<1x256xf32> to vector<8x256xf32>
    %124 = arith.subf %122, %123 : vector<8x256xf32>
    %125 = arith.mulf %124, %124 : vector<8x256xf32>
    %126 = arith.addf %119, %125 : vector<8x256xf32>
    %127 = vector.extract_strided_slice %113 {offsets = [0, 2], sizes = [8, 1], strides = [1, 1]} : vector<8x4xf32> to vector<8x1xf32>
    %128 = vector.extract_strided_slice %3 {offsets = [2, 0], sizes = [1, 256], strides = [1, 1]} : vector<4x256xf32> to vector<1x256xf32>
    %129 = vector.broadcast %127 : vector<8x1xf32> to vector<8x256xf32>
    %130 = vector.broadcast %128 : vector<1x256xf32> to vector<8x256xf32>
    %131 = arith.subf %129, %130 : vector<8x256xf32>
    %132 = arith.mulf %131, %131 : vector<8x256xf32>
    %133 = arith.addf %126, %132 : vector<8x256xf32>
    %134 = vector.extract_strided_slice %113 {offsets = [0, 3], sizes = [8, 1], strides = [1, 1]} : vector<8x4xf32> to vector<8x1xf32>
    %135 = vector.extract_strided_slice %3 {offsets = [3, 0], sizes = [1, 256], strides = [1, 1]} : vector<4x256xf32> to vector<1x256xf32>
    %136 = vector.broadcast %134 : vector<8x1xf32> to vector<8x256xf32>
    %137 = vector.broadcast %135 : vector<1x256xf32> to vector<8x256xf32>
    %138 = arith.subf %136, %137 : vector<8x256xf32>
    %139 = arith.mulf %138, %138 : vector<8x256xf32>
    %140 = arith.addf %133, %139 : vector<8x256xf32>
    %cst_14 = arith.constant 1.000000e+00 : f32
    %141 = vector.broadcast %cst_14 : f32 to vector<8x256xf32>
    %142 = arith.addf %140, %141 : vector<8x256xf32>
    %143 = tpu.reciprocal %142 {approx = true} : vector<8x256xf32> -> vector<8x256xf32>
    %144 = arith.mulf %142, %143 : vector<8x256xf32>
    %cst_15 = arith.constant 2.000000e+00 : f32
    %145 = vector.broadcast %cst_15 : f32 to vector<8x256xf32>
    %146 = arith.subf %145, %144 : vector<8x256xf32>
    %147 = arith.mulf %143, %146 : vector<8x256xf32>
    %148 = arith.addf %112, %147 : vector<8x256xf32>
    %c32 = arith.constant 32 : index
    %c0_16 = arith.constant 0 : index
    %149 = vector.load %arg2[%c32, %c0_16] : memref<128x4xf32, #tpu.memory_space<vmem>>, vector<8x4xf32>
    %150 = vector.extract_strided_slice %149 {offsets = [0, 0], sizes = [8, 1], strides = [1, 1]} : vector<8x4xf32> to vector<8x1xf32>
    %151 = vector.extract_strided_slice %3 {offsets = [0, 0], sizes = [1, 256], strides = [1, 1]} : vector<4x256xf32> to vector<1x256xf32>
    %152 = vector.broadcast %150 : vector<8x1xf32> to vector<8x256xf32>
    %153 = vector.broadcast %151 : vector<1x256xf32> to vector<8x256xf32>
    %154 = arith.subf %152, %153 : vector<8x256xf32>
    %155 = arith.mulf %154, %154 : vector<8x256xf32>
    %156 = vector.extract_strided_slice %149 {offsets = [0, 1], sizes = [8, 1], strides = [1, 1]} : vector<8x4xf32> to vector<8x1xf32>
    %157 = vector.extract_strided_slice %3 {offsets = [1, 0], sizes = [1, 256], strides = [1, 1]} : vector<4x256xf32> to vector<1x256xf32>
    %158 = vector.broadcast %156 : vector<8x1xf32> to vector<8x256xf32>
    %159 = vector.broadcast %157 : vector<1x256xf32> to vector<8x256xf32>
    %160 = arith.subf %158, %159 : vector<8x256xf32>
    %161 = arith.mulf %160, %160 : vector<8x256xf32>
    %162 = arith.addf %155, %161 : vector<8x256xf32>
    %163 = vector.extract_strided_slice %149 {offsets = [0, 2], sizes = [8, 1], strides = [1, 1]} : vector<8x4xf32> to vector<8x1xf32>
    %164 = vector.extract_strided_slice %3 {offsets = [2, 0], sizes = [1, 256], strides = [1, 1]} : vector<4x256xf32> to vector<1x256xf32>
    %165 = vector.broadcast %163 : vector<8x1xf32> to vector<8x256xf32>
    %166 = vector.broadcast %164 : vector<1x256xf32> to vector<8x256xf32>
    %167 = arith.subf %165, %166 : vector<8x256xf32>
    %168 = arith.mulf %167, %167 : vector<8x256xf32>
    %169 = arith.addf %162, %168 : vector<8x256xf32>
    %170 = vector.extract_strided_slice %149 {offsets = [0, 3], sizes = [8, 1], strides = [1, 1]} : vector<8x4xf32> to vector<8x1xf32>
    %171 = vector.extract_strided_slice %3 {offsets = [3, 0], sizes = [1, 256], strides = [1, 1]} : vector<4x256xf32> to vector<1x256xf32>
    %172 = vector.broadcast %170 : vector<8x1xf32> to vector<8x256xf32>
    %173 = vector.broadcast %171 : vector<1x256xf32> to vector<8x256xf32>
    %174 = arith.subf %172, %173 : vector<8x256xf32>
    %175 = arith.mulf %174, %174 : vector<8x256xf32>
    %176 = arith.addf %169, %175 : vector<8x256xf32>
    %cst_17 = arith.constant 1.000000e+00 : f32
    %177 = vector.broadcast %cst_17 : f32 to vector<8x256xf32>
    %178 = arith.addf %176, %177 : vector<8x256xf32>
    %179 = tpu.reciprocal %178 {approx = true} : vector<8x256xf32> -> vector<8x256xf32>
    %180 = arith.mulf %178, %179 : vector<8x256xf32>
    %cst_18 = arith.constant 2.000000e+00 : f32
    %181 = vector.broadcast %cst_18 : f32 to vector<8x256xf32>
    %182 = arith.subf %181, %180 : vector<8x256xf32>
    %183 = arith.mulf %179, %182 : vector<8x256xf32>
    %184 = arith.addf %148, %183 : vector<8x256xf32>
    %c40 = arith.constant 40 : index
    %c0_19 = arith.constant 0 : index
    %185 = vector.load %arg2[%c40, %c0_19] : memref<128x4xf32, #tpu.memory_space<vmem>>, vector<8x4xf32>
    %186 = vector.extract_strided_slice %185 {offsets = [0, 0], sizes = [8, 1], strides = [1, 1]} : vector<8x4xf32> to vector<8x1xf32>
    %187 = vector.extract_strided_slice %3 {offsets = [0, 0], sizes = [1, 256], strides = [1, 1]} : vector<4x256xf32> to vector<1x256xf32>
    %188 = vector.broadcast %186 : vector<8x1xf32> to vector<8x256xf32>
    %189 = vector.broadcast %187 : vector<1x256xf32> to vector<8x256xf32>
    %190 = arith.subf %188, %189 : vector<8x256xf32>
    %191 = arith.mulf %190, %190 : vector<8x256xf32>
    %192 = vector.extract_strided_slice %185 {offsets = [0, 1], sizes = [8, 1], strides = [1, 1]} : vector<8x4xf32> to vector<8x1xf32>
    %193 = vector.extract_strided_slice %3 {offsets = [1, 0], sizes = [1, 256], strides = [1, 1]} : vector<4x256xf32> to vector<1x256xf32>
    %194 = vector.broadcast %192 : vector<8x1xf32> to vector<8x256xf32>
    %195 = vector.broadcast %193 : vector<1x256xf32> to vector<8x256xf32>
    %196 = arith.subf %194, %195 : vector<8x256xf32>
    %197 = arith.mulf %196, %196 : vector<8x256xf32>
    %198 = arith.addf %191, %197 : vector<8x256xf32>
    %199 = vector.extract_strided_slice %185 {offsets = [0, 2], sizes = [8, 1], strides = [1, 1]} : vector<8x4xf32> to vector<8x1xf32>
    %200 = vector.extract_strided_slice %3 {offsets = [2, 0], sizes = [1, 256], strides = [1, 1]} : vector<4x256xf32> to vector<1x256xf32>
    %201 = vector.broadcast %199 : vector<8x1xf32> to vector<8x256xf32>
    %202 = vector.broadcast %200 : vector<1x256xf32> to vector<8x256xf32>
    %203 = arith.subf %201, %202 : vector<8x256xf32>
    %204 = arith.mulf %203, %203 : vector<8x256xf32>
    %205 = arith.addf %198, %204 : vector<8x256xf32>
    %206 = vector.extract_strided_slice %185 {offsets = [0, 3], sizes = [8, 1], strides = [1, 1]} : vector<8x4xf32> to vector<8x1xf32>
    %207 = vector.extract_strided_slice %3 {offsets = [3, 0], sizes = [1, 256], strides = [1, 1]} : vector<4x256xf32> to vector<1x256xf32>
    %208 = vector.broadcast %206 : vector<8x1xf32> to vector<8x256xf32>
    %209 = vector.broadcast %207 : vector<1x256xf32> to vector<8x256xf32>
    %210 = arith.subf %208, %209 : vector<8x256xf32>
    %211 = arith.mulf %210, %210 : vector<8x256xf32>
    %212 = arith.addf %205, %211 : vector<8x256xf32>
    %cst_20 = arith.constant 1.000000e+00 : f32
    %213 = vector.broadcast %cst_20 : f32 to vector<8x256xf32>
    %214 = arith.addf %212, %213 : vector<8x256xf32>
    %215 = tpu.reciprocal %214 {approx = true} : vector<8x256xf32> -> vector<8x256xf32>
    %216 = arith.mulf %214, %215 : vector<8x256xf32>
    %cst_21 = arith.constant 2.000000e+00 : f32
    %217 = vector.broadcast %cst_21 : f32 to vector<8x256xf32>
    %218 = arith.subf %217, %216 : vector<8x256xf32>
    %219 = arith.mulf %215, %218 : vector<8x256xf32>
    %220 = arith.addf %184, %219 : vector<8x256xf32>
    %c48 = arith.constant 48 : index
    %c0_22 = arith.constant 0 : index
    %221 = vector.load %arg2[%c48, %c0_22] : memref<128x4xf32, #tpu.memory_space<vmem>>, vector<8x4xf32>
    %222 = vector.extract_strided_slice %221 {offsets = [0, 0], sizes = [8, 1], strides = [1, 1]} : vector<8x4xf32> to vector<8x1xf32>
    %223 = vector.extract_strided_slice %3 {offsets = [0, 0], sizes = [1, 256], strides = [1, 1]} : vector<4x256xf32> to vector<1x256xf32>
    %224 = vector.broadcast %222 : vector<8x1xf32> to vector<8x256xf32>
    %225 = vector.broadcast %223 : vector<1x256xf32> to vector<8x256xf32>
    %226 = arith.subf %224, %225 : vector<8x256xf32>
    %227 = arith.mulf %226, %226 : vector<8x256xf32>
    %228 = vector.extract_strided_slice %221 {offsets = [0, 1], sizes = [8, 1], strides = [1, 1]} : vector<8x4xf32> to vector<8x1xf32>
    %229 = vector.extract_strided_slice %3 {offsets = [1, 0], sizes = [1, 256], strides = [1, 1]} : vector<4x256xf32> to vector<1x256xf32>
    %230 = vector.broadcast %228 : vector<8x1xf32> to vector<8x256xf32>
    %231 = vector.broadcast %229 : vector<1x256xf32> to vector<8x256xf32>
    %232 = arith.subf %230, %231 : vector<8x256xf32>
    %233 = arith.mulf %232, %232 : vector<8x256xf32>
    %234 = arith.addf %227, %233 : vector<8x256xf32>
    %235 = vector.extract_strided_slice %221 {offsets = [0, 2], sizes = [8, 1], strides = [1, 1]} : vector<8x4xf32> to vector<8x1xf32>
    %236 = vector.extract_strided_slice %3 {offsets = [2, 0], sizes = [1, 256], strides = [1, 1]} : vector<4x256xf32> to vector<1x256xf32>
    %237 = vector.broadcast %235 : vector<8x1xf32> to vector<8x256xf32>
    %238 = vector.broadcast %236 : vector<1x256xf32> to vector<8x256xf32>
    %239 = arith.subf %237, %238 : vector<8x256xf32>
    %240 = arith.mulf %239, %239 : vector<8x256xf32>
    %241 = arith.addf %234, %240 : vector<8x256xf32>
    %242 = vector.extract_strided_slice %221 {offsets = [0, 3], sizes = [8, 1], strides = [1, 1]} : vector<8x4xf32> to vector<8x1xf32>
    %243 = vector.extract_strided_slice %3 {offsets = [3, 0], sizes = [1, 256], strides = [1, 1]} : vector<4x256xf32> to vector<1x256xf32>
    %244 = vector.broadcast %242 : vector<8x1xf32> to vector<8x256xf32>
    %245 = vector.broadcast %243 : vector<1x256xf32> to vector<8x256xf32>
    %246 = arith.subf %244, %245 : vector<8x256xf32>
    %247 = arith.mulf %246, %246 : vector<8x256xf32>
    %248 = arith.addf %241, %247 : vector<8x256xf32>
    %cst_23 = arith.constant 1.000000e+00 : f32
    %249 = vector.broadcast %cst_23 : f32 to vector<8x256xf32>
    %250 = arith.addf %248, %249 : vector<8x256xf32>
    %251 = tpu.reciprocal %250 {approx = true} : vector<8x256xf32> -> vector<8x256xf32>
    %252 = arith.mulf %250, %251 : vector<8x256xf32>
    %cst_24 = arith.constant 2.000000e+00 : f32
    %253 = vector.broadcast %cst_24 : f32 to vector<8x256xf32>
    %254 = arith.subf %253, %252 : vector<8x256xf32>
    %255 = arith.mulf %251, %254 : vector<8x256xf32>
    %256 = arith.addf %220, %255 : vector<8x256xf32>
    %c56 = arith.constant 56 : index
    %c0_25 = arith.constant 0 : index
    %257 = vector.load %arg2[%c56, %c0_25] : memref<128x4xf32, #tpu.memory_space<vmem>>, vector<8x4xf32>
    %258 = vector.extract_strided_slice %257 {offsets = [0, 0], sizes = [8, 1], strides = [1, 1]} : vector<8x4xf32> to vector<8x1xf32>
    %259 = vector.extract_strided_slice %3 {offsets = [0, 0], sizes = [1, 256], strides = [1, 1]} : vector<4x256xf32> to vector<1x256xf32>
    %260 = vector.broadcast %258 : vector<8x1xf32> to vector<8x256xf32>
    %261 = vector.broadcast %259 : vector<1x256xf32> to vector<8x256xf32>
    %262 = arith.subf %260, %261 : vector<8x256xf32>
    %263 = arith.mulf %262, %262 : vector<8x256xf32>
    %264 = vector.extract_strided_slice %257 {offsets = [0, 1], sizes = [8, 1], strides = [1, 1]} : vector<8x4xf32> to vector<8x1xf32>
    %265 = vector.extract_strided_slice %3 {offsets = [1, 0], sizes = [1, 256], strides = [1, 1]} : vector<4x256xf32> to vector<1x256xf32>
    %266 = vector.broadcast %264 : vector<8x1xf32> to vector<8x256xf32>
    %267 = vector.broadcast %265 : vector<1x256xf32> to vector<8x256xf32>
    %268 = arith.subf %266, %267 : vector<8x256xf32>
    %269 = arith.mulf %268, %268 : vector<8x256xf32>
    %270 = arith.addf %263, %269 : vector<8x256xf32>
    %271 = vector.extract_strided_slice %257 {offsets = [0, 2], sizes = [8, 1], strides = [1, 1]} : vector<8x4xf32> to vector<8x1xf32>
    %272 = vector.extract_strided_slice %3 {offsets = [2, 0], sizes = [1, 256], strides = [1, 1]} : vector<4x256xf32> to vector<1x256xf32>
    %273 = vector.broadcast %271 : vector<8x1xf32> to vector<8x256xf32>
    %274 = vector.broadcast %272 : vector<1x256xf32> to vector<8x256xf32>
    %275 = arith.subf %273, %274 : vector<8x256xf32>
    %276 = arith.mulf %275, %275 : vector<8x256xf32>
    %277 = arith.addf %270, %276 : vector<8x256xf32>
    %278 = vector.extract_strided_slice %257 {offsets = [0, 3], sizes = [8, 1], strides = [1, 1]} : vector<8x4xf32> to vector<8x1xf32>
    %279 = vector.extract_strided_slice %3 {offsets = [3, 0], sizes = [1, 256], strides = [1, 1]} : vector<4x256xf32> to vector<1x256xf32>
    %280 = vector.broadcast %278 : vector<8x1xf32> to vector<8x256xf32>
    %281 = vector.broadcast %279 : vector<1x256xf32> to vector<8x256xf32>
    %282 = arith.subf %280, %281 : vector<8x256xf32>
    %283 = arith.mulf %282, %282 : vector<8x256xf32>
    %284 = arith.addf %277, %283 : vector<8x256xf32>
    %cst_26 = arith.constant 1.000000e+00 : f32
    %285 = vector.broadcast %cst_26 : f32 to vector<8x256xf32>
    %286 = arith.addf %284, %285 : vector<8x256xf32>
    %287 = tpu.reciprocal %286 {approx = true} : vector<8x256xf32> -> vector<8x256xf32>
    %288 = arith.mulf %286, %287 : vector<8x256xf32>
    %cst_27 = arith.constant 2.000000e+00 : f32
    %289 = vector.broadcast %cst_27 : f32 to vector<8x256xf32>
    %290 = arith.subf %289, %288 : vector<8x256xf32>
    %291 = arith.mulf %287, %290 : vector<8x256xf32>
    %292 = arith.addf %256, %291 : vector<8x256xf32>
    %c64 = arith.constant 64 : index
    %c0_28 = arith.constant 0 : index
    %293 = vector.load %arg2[%c64, %c0_28] : memref<128x4xf32, #tpu.memory_space<vmem>>, vector<8x4xf32>
    %294 = vector.extract_strided_slice %293 {offsets = [0, 0], sizes = [8, 1], strides = [1, 1]} : vector<8x4xf32> to vector<8x1xf32>
    %295 = vector.extract_strided_slice %3 {offsets = [0, 0], sizes = [1, 256], strides = [1, 1]} : vector<4x256xf32> to vector<1x256xf32>
    %296 = vector.broadcast %294 : vector<8x1xf32> to vector<8x256xf32>
    %297 = vector.broadcast %295 : vector<1x256xf32> to vector<8x256xf32>
    %298 = arith.subf %296, %297 : vector<8x256xf32>
    %299 = arith.mulf %298, %298 : vector<8x256xf32>
    %300 = vector.extract_strided_slice %293 {offsets = [0, 1], sizes = [8, 1], strides = [1, 1]} : vector<8x4xf32> to vector<8x1xf32>
    %301 = vector.extract_strided_slice %3 {offsets = [1, 0], sizes = [1, 256], strides = [1, 1]} : vector<4x256xf32> to vector<1x256xf32>
    %302 = vector.broadcast %300 : vector<8x1xf32> to vector<8x256xf32>
    %303 = vector.broadcast %301 : vector<1x256xf32> to vector<8x256xf32>
    %304 = arith.subf %302, %303 : vector<8x256xf32>
    %305 = arith.mulf %304, %304 : vector<8x256xf32>
    %306 = arith.addf %299, %305 : vector<8x256xf32>
    %307 = vector.extract_strided_slice %293 {offsets = [0, 2], sizes = [8, 1], strides = [1, 1]} : vector<8x4xf32> to vector<8x1xf32>
    %308 = vector.extract_strided_slice %3 {offsets = [2, 0], sizes = [1, 256], strides = [1, 1]} : vector<4x256xf32> to vector<1x256xf32>
    %309 = vector.broadcast %307 : vector<8x1xf32> to vector<8x256xf32>
    %310 = vector.broadcast %308 : vector<1x256xf32> to vector<8x256xf32>
    %311 = arith.subf %309, %310 : vector<8x256xf32>
    %312 = arith.mulf %311, %311 : vector<8x256xf32>
    %313 = arith.addf %306, %312 : vector<8x256xf32>
    %314 = vector.extract_strided_slice %293 {offsets = [0, 3], sizes = [8, 1], strides = [1, 1]} : vector<8x4xf32> to vector<8x1xf32>
    %315 = vector.extract_strided_slice %3 {offsets = [3, 0], sizes = [1, 256], strides = [1, 1]} : vector<4x256xf32> to vector<1x256xf32>
    %316 = vector.broadcast %314 : vector<8x1xf32> to vector<8x256xf32>
    %317 = vector.broadcast %315 : vector<1x256xf32> to vector<8x256xf32>
    %318 = arith.subf %316, %317 : vector<8x256xf32>
    %319 = arith.mulf %318, %318 : vector<8x256xf32>
    %320 = arith.addf %313, %319 : vector<8x256xf32>
    %cst_29 = arith.constant 1.000000e+00 : f32
    %321 = vector.broadcast %cst_29 : f32 to vector<8x256xf32>
    %322 = arith.addf %320, %321 : vector<8x256xf32>
    %323 = tpu.reciprocal %322 {approx = true} : vector<8x256xf32> -> vector<8x256xf32>
    %324 = arith.mulf %322, %323 : vector<8x256xf32>
    %cst_30 = arith.constant 2.000000e+00 : f32
    %325 = vector.broadcast %cst_30 : f32 to vector<8x256xf32>
    %326 = arith.subf %325, %324 : vector<8x256xf32>
    %327 = arith.mulf %323, %326 : vector<8x256xf32>
    %328 = arith.addf %292, %327 : vector<8x256xf32>
    %c72 = arith.constant 72 : index
    %c0_31 = arith.constant 0 : index
    %329 = vector.load %arg2[%c72, %c0_31] : memref<128x4xf32, #tpu.memory_space<vmem>>, vector<8x4xf32>
    %330 = vector.extract_strided_slice %329 {offsets = [0, 0], sizes = [8, 1], strides = [1, 1]} : vector<8x4xf32> to vector<8x1xf32>
    %331 = vector.extract_strided_slice %3 {offsets = [0, 0], sizes = [1, 256], strides = [1, 1]} : vector<4x256xf32> to vector<1x256xf32>
    %332 = vector.broadcast %330 : vector<8x1xf32> to vector<8x256xf32>
    %333 = vector.broadcast %331 : vector<1x256xf32> to vector<8x256xf32>
    %334 = arith.subf %332, %333 : vector<8x256xf32>
    %335 = arith.mulf %334, %334 : vector<8x256xf32>
    %336 = vector.extract_strided_slice %329 {offsets = [0, 1], sizes = [8, 1], strides = [1, 1]} : vector<8x4xf32> to vector<8x1xf32>
    %337 = vector.extract_strided_slice %3 {offsets = [1, 0], sizes = [1, 256], strides = [1, 1]} : vector<4x256xf32> to vector<1x256xf32>
    %338 = vector.broadcast %336 : vector<8x1xf32> to vector<8x256xf32>
    %339 = vector.broadcast %337 : vector<1x256xf32> to vector<8x256xf32>
    %340 = arith.subf %338, %339 : vector<8x256xf32>
    %341 = arith.mulf %340, %340 : vector<8x256xf32>
    %342 = arith.addf %335, %341 : vector<8x256xf32>
    %343 = vector.extract_strided_slice %329 {offsets = [0, 2], sizes = [8, 1], strides = [1, 1]} : vector<8x4xf32> to vector<8x1xf32>
    %344 = vector.extract_strided_slice %3 {offsets = [2, 0], sizes = [1, 256], strides = [1, 1]} : vector<4x256xf32> to vector<1x256xf32>
    %345 = vector.broadcast %343 : vector<8x1xf32> to vector<8x256xf32>
    %346 = vector.broadcast %344 : vector<1x256xf32> to vector<8x256xf32>
    %347 = arith.subf %345, %346 : vector<8x256xf32>
    %348 = arith.mulf %347, %347 : vector<8x256xf32>
    %349 = arith.addf %342, %348 : vector<8x256xf32>
    %350 = vector.extract_strided_slice %329 {offsets = [0, 3], sizes = [8, 1], strides = [1, 1]} : vector<8x4xf32> to vector<8x1xf32>
    %351 = vector.extract_strided_slice %3 {offsets = [3, 0], sizes = [1, 256], strides = [1, 1]} : vector<4x256xf32> to vector<1x256xf32>
    %352 = vector.broadcast %350 : vector<8x1xf32> to vector<8x256xf32>
    %353 = vector.broadcast %351 : vector<1x256xf32> to vector<8x256xf32>
    %354 = arith.subf %352, %353 : vector<8x256xf32>
    %355 = arith.mulf %354, %354 : vector<8x256xf32>
    %356 = arith.addf %349, %355 : vector<8x256xf32>
    %cst_32 = arith.constant 1.000000e+00 : f32
    %357 = vector.broadcast %cst_32 : f32 to vector<8x256xf32>
    %358 = arith.addf %356, %357 : vector<8x256xf32>
    %359 = tpu.reciprocal %358 {approx = true} : vector<8x256xf32> -> vector<8x256xf32>
    %360 = arith.mulf %358, %359 : vector<8x256xf32>
    %cst_33 = arith.constant 2.000000e+00 : f32
    %361 = vector.broadcast %cst_33 : f32 to vector<8x256xf32>
    %362 = arith.subf %361, %360 : vector<8x256xf32>
    %363 = arith.mulf %359, %362 : vector<8x256xf32>
    %364 = arith.addf %328, %363 : vector<8x256xf32>
    %c80 = arith.constant 80 : index
    %c0_34 = arith.constant 0 : index
    %365 = vector.load %arg2[%c80, %c0_34] : memref<128x4xf32, #tpu.memory_space<vmem>>, vector<8x4xf32>
    %366 = vector.extract_strided_slice %365 {offsets = [0, 0], sizes = [8, 1], strides = [1, 1]} : vector<8x4xf32> to vector<8x1xf32>
    %367 = vector.extract_strided_slice %3 {offsets = [0, 0], sizes = [1, 256], strides = [1, 1]} : vector<4x256xf32> to vector<1x256xf32>
    %368 = vector.broadcast %366 : vector<8x1xf32> to vector<8x256xf32>
    %369 = vector.broadcast %367 : vector<1x256xf32> to vector<8x256xf32>
    %370 = arith.subf %368, %369 : vector<8x256xf32>
    %371 = arith.mulf %370, %370 : vector<8x256xf32>
    %372 = vector.extract_strided_slice %365 {offsets = [0, 1], sizes = [8, 1], strides = [1, 1]} : vector<8x4xf32> to vector<8x1xf32>
    %373 = vector.extract_strided_slice %3 {offsets = [1, 0], sizes = [1, 256], strides = [1, 1]} : vector<4x256xf32> to vector<1x256xf32>
    %374 = vector.broadcast %372 : vector<8x1xf32> to vector<8x256xf32>
    %375 = vector.broadcast %373 : vector<1x256xf32> to vector<8x256xf32>
    %376 = arith.subf %374, %375 : vector<8x256xf32>
    %377 = arith.mulf %376, %376 : vector<8x256xf32>
    %378 = arith.addf %371, %377 : vector<8x256xf32>
    %379 = vector.extract_strided_slice %365 {offsets = [0, 2], sizes = [8, 1], strides = [1, 1]} : vector<8x4xf32> to vector<8x1xf32>
    %380 = vector.extract_strided_slice %3 {offsets = [2, 0], sizes = [1, 256], strides = [1, 1]} : vector<4x256xf32> to vector<1x256xf32>
    %381 = vector.broadcast %379 : vector<8x1xf32> to vector<8x256xf32>
    %382 = vector.broadcast %380 : vector<1x256xf32> to vector<8x256xf32>
    %383 = arith.subf %381, %382 : vector<8x256xf32>
    %384 = arith.mulf %383, %383 : vector<8x256xf32>
    %385 = arith.addf %378, %384 : vector<8x256xf32>
    %386 = vector.extract_strided_slice %365 {offsets = [0, 3], sizes = [8, 1], strides = [1, 1]} : vector<8x4xf32> to vector<8x1xf32>
    %387 = vector.extract_strided_slice %3 {offsets = [3, 0], sizes = [1, 256], strides = [1, 1]} : vector<4x256xf32> to vector<1x256xf32>
    %388 = vector.broadcast %386 : vector<8x1xf32> to vector<8x256xf32>
    %389 = vector.broadcast %387 : vector<1x256xf32> to vector<8x256xf32>
    %390 = arith.subf %388, %389 : vector<8x256xf32>
    %391 = arith.mulf %390, %390 : vector<8x256xf32>
    %392 = arith.addf %385, %391 : vector<8x256xf32>
    %cst_35 = arith.constant 1.000000e+00 : f32
    %393 = vector.broadcast %cst_35 : f32 to vector<8x256xf32>
    %394 = arith.addf %392, %393 : vector<8x256xf32>
    %395 = tpu.reciprocal %394 {approx = true} : vector<8x256xf32> -> vector<8x256xf32>
    %396 = arith.mulf %394, %395 : vector<8x256xf32>
    %cst_36 = arith.constant 2.000000e+00 : f32
    %397 = vector.broadcast %cst_36 : f32 to vector<8x256xf32>
    %398 = arith.subf %397, %396 : vector<8x256xf32>
    %399 = arith.mulf %395, %398 : vector<8x256xf32>
    %400 = arith.addf %364, %399 : vector<8x256xf32>
    %c88 = arith.constant 88 : index
    %c0_37 = arith.constant 0 : index
    %401 = vector.load %arg2[%c88, %c0_37] : memref<128x4xf32, #tpu.memory_space<vmem>>, vector<8x4xf32>
    %402 = vector.extract_strided_slice %401 {offsets = [0, 0], sizes = [8, 1], strides = [1, 1]} : vector<8x4xf32> to vector<8x1xf32>
    %403 = vector.extract_strided_slice %3 {offsets = [0, 0], sizes = [1, 256], strides = [1, 1]} : vector<4x256xf32> to vector<1x256xf32>
    %404 = vector.broadcast %402 : vector<8x1xf32> to vector<8x256xf32>
    %405 = vector.broadcast %403 : vector<1x256xf32> to vector<8x256xf32>
    %406 = arith.subf %404, %405 : vector<8x256xf32>
    %407 = arith.mulf %406, %406 : vector<8x256xf32>
    %408 = vector.extract_strided_slice %401 {offsets = [0, 1], sizes = [8, 1], strides = [1, 1]} : vector<8x4xf32> to vector<8x1xf32>
    %409 = vector.extract_strided_slice %3 {offsets = [1, 0], sizes = [1, 256], strides = [1, 1]} : vector<4x256xf32> to vector<1x256xf32>
    %410 = vector.broadcast %408 : vector<8x1xf32> to vector<8x256xf32>
    %411 = vector.broadcast %409 : vector<1x256xf32> to vector<8x256xf32>
    %412 = arith.subf %410, %411 : vector<8x256xf32>
    %413 = arith.mulf %412, %412 : vector<8x256xf32>
    %414 = arith.addf %407, %413 : vector<8x256xf32>
    %415 = vector.extract_strided_slice %401 {offsets = [0, 2], sizes = [8, 1], strides = [1, 1]} : vector<8x4xf32> to vector<8x1xf32>
    %416 = vector.extract_strided_slice %3 {offsets = [2, 0], sizes = [1, 256], strides = [1, 1]} : vector<4x256xf32> to vector<1x256xf32>
    %417 = vector.broadcast %415 : vector<8x1xf32> to vector<8x256xf32>
    %418 = vector.broadcast %416 : vector<1x256xf32> to vector<8x256xf32>
    %419 = arith.subf %417, %418 : vector<8x256xf32>
    %420 = arith.mulf %419, %419 : vector<8x256xf32>
    %421 = arith.addf %414, %420 : vector<8x256xf32>
    %422 = vector.extract_strided_slice %401 {offsets = [0, 3], sizes = [8, 1], strides = [1, 1]} : vector<8x4xf32> to vector<8x1xf32>
    %423 = vector.extract_strided_slice %3 {offsets = [3, 0], sizes = [1, 256], strides = [1, 1]} : vector<4x256xf32> to vector<1x256xf32>
    %424 = vector.broadcast %422 : vector<8x1xf32> to vector<8x256xf32>
    %425 = vector.broadcast %423 : vector<1x256xf32> to vector<8x256xf32>
    %426 = arith.subf %424, %425 : vector<8x256xf32>
    %427 = arith.mulf %426, %426 : vector<8x256xf32>
    %428 = arith.addf %421, %427 : vector<8x256xf32>
    %cst_38 = arith.constant 1.000000e+00 : f32
    %429 = vector.broadcast %cst_38 : f32 to vector<8x256xf32>
    %430 = arith.addf %428, %429 : vector<8x256xf32>
    %431 = tpu.reciprocal %430 {approx = true} : vector<8x256xf32> -> vector<8x256xf32>
    %432 = arith.mulf %430, %431 : vector<8x256xf32>
    %cst_39 = arith.constant 2.000000e+00 : f32
    %433 = vector.broadcast %cst_39 : f32 to vector<8x256xf32>
    %434 = arith.subf %433, %432 : vector<8x256xf32>
    %435 = arith.mulf %431, %434 : vector<8x256xf32>
    %436 = arith.addf %400, %435 : vector<8x256xf32>
    %c96 = arith.constant 96 : index
    %c0_40 = arith.constant 0 : index
    %437 = vector.load %arg2[%c96, %c0_40] : memref<128x4xf32, #tpu.memory_space<vmem>>, vector<8x4xf32>
    %438 = vector.extract_strided_slice %437 {offsets = [0, 0], sizes = [8, 1], strides = [1, 1]} : vector<8x4xf32> to vector<8x1xf32>
    %439 = vector.extract_strided_slice %3 {offsets = [0, 0], sizes = [1, 256], strides = [1, 1]} : vector<4x256xf32> to vector<1x256xf32>
    %440 = vector.broadcast %438 : vector<8x1xf32> to vector<8x256xf32>
    %441 = vector.broadcast %439 : vector<1x256xf32> to vector<8x256xf32>
    %442 = arith.subf %440, %441 : vector<8x256xf32>
    %443 = arith.mulf %442, %442 : vector<8x256xf32>
    %444 = vector.extract_strided_slice %437 {offsets = [0, 1], sizes = [8, 1], strides = [1, 1]} : vector<8x4xf32> to vector<8x1xf32>
    %445 = vector.extract_strided_slice %3 {offsets = [1, 0], sizes = [1, 256], strides = [1, 1]} : vector<4x256xf32> to vector<1x256xf32>
    %446 = vector.broadcast %444 : vector<8x1xf32> to vector<8x256xf32>
    %447 = vector.broadcast %445 : vector<1x256xf32> to vector<8x256xf32>
    %448 = arith.subf %446, %447 : vector<8x256xf32>
    %449 = arith.mulf %448, %448 : vector<8x256xf32>
    %450 = arith.addf %443, %449 : vector<8x256xf32>
    %451 = vector.extract_strided_slice %437 {offsets = [0, 2], sizes = [8, 1], strides = [1, 1]} : vector<8x4xf32> to vector<8x1xf32>
    %452 = vector.extract_strided_slice %3 {offsets = [2, 0], sizes = [1, 256], strides = [1, 1]} : vector<4x256xf32> to vector<1x256xf32>
    %453 = vector.broadcast %451 : vector<8x1xf32> to vector<8x256xf32>
    %454 = vector.broadcast %452 : vector<1x256xf32> to vector<8x256xf32>
    %455 = arith.subf %453, %454 : vector<8x256xf32>
    %456 = arith.mulf %455, %455 : vector<8x256xf32>
    %457 = arith.addf %450, %456 : vector<8x256xf32>
    %458 = vector.extract_strided_slice %437 {offsets = [0, 3], sizes = [8, 1], strides = [1, 1]} : vector<8x4xf32> to vector<8x1xf32>
    %459 = vector.extract_strided_slice %3 {offsets = [3, 0], sizes = [1, 256], strides = [1, 1]} : vector<4x256xf32> to vector<1x256xf32>
    %460 = vector.broadcast %458 : vector<8x1xf32> to vector<8x256xf32>
    %461 = vector.broadcast %459 : vector<1x256xf32> to vector<8x256xf32>
    %462 = arith.subf %460, %461 : vector<8x256xf32>
    %463 = arith.mulf %462, %462 : vector<8x256xf32>
    %464 = arith.addf %457, %463 : vector<8x256xf32>
    %cst_41 = arith.constant 1.000000e+00 : f32
    %465 = vector.broadcast %cst_41 : f32 to vector<8x256xf32>
    %466 = arith.addf %464, %465 : vector<8x256xf32>
    %467 = tpu.reciprocal %466 {approx = true} : vector<8x256xf32> -> vector<8x256xf32>
    %468 = arith.mulf %466, %467 : vector<8x256xf32>
    %cst_42 = arith.constant 2.000000e+00 : f32
    %469 = vector.broadcast %cst_42 : f32 to vector<8x256xf32>
    %470 = arith.subf %469, %468 : vector<8x256xf32>
    %471 = arith.mulf %467, %470 : vector<8x256xf32>
    %472 = arith.addf %436, %471 : vector<8x256xf32>
    %c104 = arith.constant 104 : index
    %c0_43 = arith.constant 0 : index
    %473 = vector.load %arg2[%c104, %c0_43] : memref<128x4xf32, #tpu.memory_space<vmem>>, vector<8x4xf32>
    %474 = vector.extract_strided_slice %473 {offsets = [0, 0], sizes = [8, 1], strides = [1, 1]} : vector<8x4xf32> to vector<8x1xf32>
    %475 = vector.extract_strided_slice %3 {offsets = [0, 0], sizes = [1, 256], strides = [1, 1]} : vector<4x256xf32> to vector<1x256xf32>
    %476 = vector.broadcast %474 : vector<8x1xf32> to vector<8x256xf32>
    %477 = vector.broadcast %475 : vector<1x256xf32> to vector<8x256xf32>
    %478 = arith.subf %476, %477 : vector<8x256xf32>
    %479 = arith.mulf %478, %478 : vector<8x256xf32>
    %480 = vector.extract_strided_slice %473 {offsets = [0, 1], sizes = [8, 1], strides = [1, 1]} : vector<8x4xf32> to vector<8x1xf32>
    %481 = vector.extract_strided_slice %3 {offsets = [1, 0], sizes = [1, 256], strides = [1, 1]} : vector<4x256xf32> to vector<1x256xf32>
    %482 = vector.broadcast %480 : vector<8x1xf32> to vector<8x256xf32>
    %483 = vector.broadcast %481 : vector<1x256xf32> to vector<8x256xf32>
    %484 = arith.subf %482, %483 : vector<8x256xf32>
    %485 = arith.mulf %484, %484 : vector<8x256xf32>
    %486 = arith.addf %479, %485 : vector<8x256xf32>
    %487 = vector.extract_strided_slice %473 {offsets = [0, 2], sizes = [8, 1], strides = [1, 1]} : vector<8x4xf32> to vector<8x1xf32>
    %488 = vector.extract_strided_slice %3 {offsets = [2, 0], sizes = [1, 256], strides = [1, 1]} : vector<4x256xf32> to vector<1x256xf32>
    %489 = vector.broadcast %487 : vector<8x1xf32> to vector<8x256xf32>
    %490 = vector.broadcast %488 : vector<1x256xf32> to vector<8x256xf32>
    %491 = arith.subf %489, %490 : vector<8x256xf32>
    %492 = arith.mulf %491, %491 : vector<8x256xf32>
    %493 = arith.addf %486, %492 : vector<8x256xf32>
    %494 = vector.extract_strided_slice %473 {offsets = [0, 3], sizes = [8, 1], strides = [1, 1]} : vector<8x4xf32> to vector<8x1xf32>
    %495 = vector.extract_strided_slice %3 {offsets = [3, 0], sizes = [1, 256], strides = [1, 1]} : vector<4x256xf32> to vector<1x256xf32>
    %496 = vector.broadcast %494 : vector<8x1xf32> to vector<8x256xf32>
    %497 = vector.broadcast %495 : vector<1x256xf32> to vector<8x256xf32>
    %498 = arith.subf %496, %497 : vector<8x256xf32>
    %499 = arith.mulf %498, %498 : vector<8x256xf32>
    %500 = arith.addf %493, %499 : vector<8x256xf32>
    %cst_44 = arith.constant 1.000000e+00 : f32
    %501 = vector.broadcast %cst_44 : f32 to vector<8x256xf32>
    %502 = arith.addf %500, %501 : vector<8x256xf32>
    %503 = tpu.reciprocal %502 {approx = true} : vector<8x256xf32> -> vector<8x256xf32>
    %504 = arith.mulf %502, %503 : vector<8x256xf32>
    %cst_45 = arith.constant 2.000000e+00 : f32
    %505 = vector.broadcast %cst_45 : f32 to vector<8x256xf32>
    %506 = arith.subf %505, %504 : vector<8x256xf32>
    %507 = arith.mulf %503, %506 : vector<8x256xf32>
    %508 = arith.addf %472, %507 : vector<8x256xf32>
    %c112 = arith.constant 112 : index
    %c0_46 = arith.constant 0 : index
    %509 = vector.load %arg2[%c112, %c0_46] : memref<128x4xf32, #tpu.memory_space<vmem>>, vector<8x4xf32>
    %510 = vector.extract_strided_slice %509 {offsets = [0, 0], sizes = [8, 1], strides = [1, 1]} : vector<8x4xf32> to vector<8x1xf32>
    %511 = vector.extract_strided_slice %3 {offsets = [0, 0], sizes = [1, 256], strides = [1, 1]} : vector<4x256xf32> to vector<1x256xf32>
    %512 = vector.broadcast %510 : vector<8x1xf32> to vector<8x256xf32>
    %513 = vector.broadcast %511 : vector<1x256xf32> to vector<8x256xf32>
    %514 = arith.subf %512, %513 : vector<8x256xf32>
    %515 = arith.mulf %514, %514 : vector<8x256xf32>
    %516 = vector.extract_strided_slice %509 {offsets = [0, 1], sizes = [8, 1], strides = [1, 1]} : vector<8x4xf32> to vector<8x1xf32>
    %517 = vector.extract_strided_slice %3 {offsets = [1, 0], sizes = [1, 256], strides = [1, 1]} : vector<4x256xf32> to vector<1x256xf32>
    %518 = vector.broadcast %516 : vector<8x1xf32> to vector<8x256xf32>
    %519 = vector.broadcast %517 : vector<1x256xf32> to vector<8x256xf32>
    %520 = arith.subf %518, %519 : vector<8x256xf32>
    %521 = arith.mulf %520, %520 : vector<8x256xf32>
    %522 = arith.addf %515, %521 : vector<8x256xf32>
    %523 = vector.extract_strided_slice %509 {offsets = [0, 2], sizes = [8, 1], strides = [1, 1]} : vector<8x4xf32> to vector<8x1xf32>
    %524 = vector.extract_strided_slice %3 {offsets = [2, 0], sizes = [1, 256], strides = [1, 1]} : vector<4x256xf32> to vector<1x256xf32>
    %525 = vector.broadcast %523 : vector<8x1xf32> to vector<8x256xf32>
    %526 = vector.broadcast %524 : vector<1x256xf32> to vector<8x256xf32>
    %527 = arith.subf %525, %526 : vector<8x256xf32>
    %528 = arith.mulf %527, %527 : vector<8x256xf32>
    %529 = arith.addf %522, %528 : vector<8x256xf32>
    %530 = vector.extract_strided_slice %509 {offsets = [0, 3], sizes = [8, 1], strides = [1, 1]} : vector<8x4xf32> to vector<8x1xf32>
    %531 = vector.extract_strided_slice %3 {offsets = [3, 0], sizes = [1, 256], strides = [1, 1]} : vector<4x256xf32> to vector<1x256xf32>
    %532 = vector.broadcast %530 : vector<8x1xf32> to vector<8x256xf32>
    %533 = vector.broadcast %531 : vector<1x256xf32> to vector<8x256xf32>
    %534 = arith.subf %532, %533 : vector<8x256xf32>
    %535 = arith.mulf %534, %534 : vector<8x256xf32>
    %536 = arith.addf %529, %535 : vector<8x256xf32>
    %cst_47 = arith.constant 1.000000e+00 : f32
    %537 = vector.broadcast %cst_47 : f32 to vector<8x256xf32>
    %538 = arith.addf %536, %537 : vector<8x256xf32>
    %539 = tpu.reciprocal %538 {approx = true} : vector<8x256xf32> -> vector<8x256xf32>
    %540 = arith.mulf %538, %539 : vector<8x256xf32>
    %cst_48 = arith.constant 2.000000e+00 : f32
    %541 = vector.broadcast %cst_48 : f32 to vector<8x256xf32>
    %542 = arith.subf %541, %540 : vector<8x256xf32>
    %543 = arith.mulf %539, %542 : vector<8x256xf32>
    %544 = arith.addf %508, %543 : vector<8x256xf32>
    %c120 = arith.constant 120 : index
    %c0_49 = arith.constant 0 : index
    %545 = vector.load %arg2[%c120, %c0_49] : memref<128x4xf32, #tpu.memory_space<vmem>>, vector<8x4xf32>
    %546 = vector.extract_strided_slice %545 {offsets = [0, 0], sizes = [8, 1], strides = [1, 1]} : vector<8x4xf32> to vector<8x1xf32>
    %547 = vector.extract_strided_slice %3 {offsets = [0, 0], sizes = [1, 256], strides = [1, 1]} : vector<4x256xf32> to vector<1x256xf32>
    %548 = vector.broadcast %546 : vector<8x1xf32> to vector<8x256xf32>
    %549 = vector.broadcast %547 : vector<1x256xf32> to vector<8x256xf32>
    %550 = arith.subf %548, %549 : vector<8x256xf32>
    %551 = arith.mulf %550, %550 : vector<8x256xf32>
    %552 = vector.extract_strided_slice %545 {offsets = [0, 1], sizes = [8, 1], strides = [1, 1]} : vector<8x4xf32> to vector<8x1xf32>
    %553 = vector.extract_strided_slice %3 {offsets = [1, 0], sizes = [1, 256], strides = [1, 1]} : vector<4x256xf32> to vector<1x256xf32>
    %554 = vector.broadcast %552 : vector<8x1xf32> to vector<8x256xf32>
    %555 = vector.broadcast %553 : vector<1x256xf32> to vector<8x256xf32>
    %556 = arith.subf %554, %555 : vector<8x256xf32>
    %557 = arith.mulf %556, %556 : vector<8x256xf32>
    %558 = arith.addf %551, %557 : vector<8x256xf32>
    %559 = vector.extract_strided_slice %545 {offsets = [0, 2], sizes = [8, 1], strides = [1, 1]} : vector<8x4xf32> to vector<8x1xf32>
    %560 = vector.extract_strided_slice %3 {offsets = [2, 0], sizes = [1, 256], strides = [1, 1]} : vector<4x256xf32> to vector<1x256xf32>
    %561 = vector.broadcast %559 : vector<8x1xf32> to vector<8x256xf32>
    %562 = vector.broadcast %560 : vector<1x256xf32> to vector<8x256xf32>
    %563 = arith.subf %561, %562 : vector<8x256xf32>
    %564 = arith.mulf %563, %563 : vector<8x256xf32>
    %565 = arith.addf %558, %564 : vector<8x256xf32>
    %566 = vector.extract_strided_slice %545 {offsets = [0, 3], sizes = [8, 1], strides = [1, 1]} : vector<8x4xf32> to vector<8x1xf32>
    %567 = vector.extract_strided_slice %3 {offsets = [3, 0], sizes = [1, 256], strides = [1, 1]} : vector<4x256xf32> to vector<1x256xf32>
    %568 = vector.broadcast %566 : vector<8x1xf32> to vector<8x256xf32>
    %569 = vector.broadcast %567 : vector<1x256xf32> to vector<8x256xf32>
    %570 = arith.subf %568, %569 : vector<8x256xf32>
    %571 = arith.mulf %570, %570 : vector<8x256xf32>
    %572 = arith.addf %565, %571 : vector<8x256xf32>
    %cst_50 = arith.constant 1.000000e+00 : f32
    %573 = vector.broadcast %cst_50 : f32 to vector<8x256xf32>
    %574 = arith.addf %572, %573 : vector<8x256xf32>
    %575 = tpu.reciprocal %574 {approx = true} : vector<8x256xf32> -> vector<8x256xf32>
    %576 = arith.mulf %574, %575 : vector<8x256xf32>
    %cst_51 = arith.constant 2.000000e+00 : f32
    %577 = vector.broadcast %cst_51 : f32 to vector<8x256xf32>
    %578 = arith.subf %577, %576 : vector<8x256xf32>
    %579 = arith.mulf %575, %578 : vector<8x256xf32>
    %580 = arith.addf %544, %579 : vector<8x256xf32>
    %c0_52 = arith.constant 0 : index
    %c0_53 = arith.constant 0 : index
    %581 = vector.load %arg5[%c0_52, %c0_53] : memref<8x256xf32, #tpu.memory_space<vmem>>, vector<8x256xf32>
    tpu.vector_store %arg5[%c0_52, %c0_53], %580 {strides = array<i32>} : memref<8x256xf32, #tpu.memory_space<vmem>>, vector<8x256xf32>,
    %c1_i32 = arith.constant 1 : i32
    %582 = arith.cmpi eq, %arg1, %c1_i32 : i32
    %583 = arith.extui %582 : i1 to i32
    %c0_i32_54 = arith.constant 0 : i32
    %584 = arith.cmpi ne, %583, %c0_i32_54 : i32
    scf.if %584 {
      %c0_55 = arith.constant 0 : index
      %c0_56 = arith.constant 0 : index
      %585 = vector.load %arg5[%c0_55, %c0_56] : memref<8x256xf32, #tpu.memory_space<vmem>>, vector<8x256xf32>
      %586 = vector.extract_strided_slice %585 {offsets = [0, 0], sizes = [8, 128], strides = [1, 1]} : vector<8x256xf32> to vector<8x128xf32>
      %587 = vector.extract_strided_slice %585 {offsets = [0, 128], sizes = [8, 128], strides = [1, 1]} : vector<8x256xf32> to vector<8x128xf32>
      %588 = arith.addf %586, %587 : vector<8x128xf32>
      %c0_57 = arith.constant 0 : index
      %c0_58 = arith.constant 0 : index
      %589 = vector.load %arg4[%c0_57, %c0_58] : memref<8x128xf32, #tpu.memory_space<vmem>>, vector<8x128xf32>
      tpu.vector_store %arg4[%c0_57, %c0_58], %588 {strides = array<i32>} : memref<8x128xf32, #tpu.memory_space<vmem>>, vector<8x128xf32>,
    } else {
    }
    return
  }
  func.func @transform_0(%arg0: i32, %arg1: i32) -> (i32, i32) {
    %c0_i32 = arith.constant 0 : i32
    %c0_i32_0 = arith.constant 0 : i32
    return %arg0, %c0_i32 : i32, i32
  }
  func.func @transform_1(%arg0: i32, %arg1: i32) -> (i32, i32) {
    %c0_i32 = arith.constant 0 : i32
    %c0_i32_0 = arith.constant 0 : i32
    return %c0_i32, %arg1 : i32, i32
  }
  func.func @transform_2(%arg0: i32, %arg1: i32) -> (i32, i32) {
    %c0_i32 = arith.constant 0 : i32
    %c0_i32_0 = arith.constant 0 : i32
    return %arg0, %c0_i32 : i32, i32
  }
}

</mosaic_0001>

<bundles_post_ra>
// kernel: tsne_loss_pallas.1
= control target key start
LH: loop header
LB: loop body
LE: loop exit
PB: predicated region body
PF: predicated region fallthrough
CT: control target
= control target key end

     0   :  { %s1407_s9 = smov 0   ;;  %s1409_s10 = smov 0   ;;  %s1937_s0 = inlined_call_operand.vmem [shape: f32[512,4], index: 0, kind: input, shape index: {}]   ;;  %s1938_s1 = inlined_call_operand.vmem [shape: f32[4,512], index: 1, kind: input, shape index: {}]   ;;  %s1939_s2 = inlined_call_operand.vmem [shape: f32[32,128], index: 2, kind: output, shape index: {}]  }
   0x1   :  { %s1411_s11 = smov 0   ;;  %s1413_s12 = smov 0  }
   0x2   :  { %s1415_s13 = smov 0  }
   0x3 LB: > { %s21_s14 = sadd.s32 1, %s1377_s11  ;;  %s24_s15 = sadd.s32 1, %s1381_s12  ;;  %s1385_s13 = sphi %s1415_s13, %s12_s13   ;;  %s1381_s12 = sphi %s1413_s12, %s1947_s12   ;;  %s1377_s11 = sphi %s1411_s11, %s1946_s11   ;;  %s1373_s10 = sphi %s1409_s10, %s1945_s10   ;;  %s1369_s9 = sphi %s1407_s9, %s1944_s9  }
   0x4   : > { %p22_p0 = scmp.ge.s32.totalorder %s21_s14, 2  ;;  %p1182_p1 = scmp.ge.s32.totalorder %s1385_s13, 1 }
   0x5   : > { %p136_p2 = scmp.lt.s32.totalorder %s1385_s13, 9 }
   0x6   : > { %s1949_s14 = smov (%p22_p0, %s21_s14), 0  ;;  %s1951_s15 = smov (!%p22_p0, %s24_s15), %s1381_s12 }
   0x7   : > { %p137_p3 = pnand %p1182_p1, %p136_p2  ;;  %p26_p4 = scmp.ge.s32.totalorder %s1951_s15, 4 }
   0x8   : > { %s1183_s16 = sshll.u32 (!%p137_p3), %s1373_s10, 4  ;;  %s1185_s17 = sshll.u32 (!%p137_p3), %s1369_s9, 1 }
   0x9   : > { %s1953_s15 = smov (%p26_p4, %s1951_s15), 0  ;;  %140 = sbr.rel (%p137_p3) target bundleno = 398 (0x18e), region = 28 }
   0xa   : > { %p163_p5 = scmp.lt.s32.totalorder (!%p137_p3), %s1183_s16, 63  ;;  %p169_p6 = scmp.lt.s32.totalorder (!%p137_p3), %s1185_s17, 3 }
   0xb   : > { %p174_p7 = scmp.lt.s32.totalorder (!%p137_p3), %s1373_s10, 3  ;;  %p1188_p8 = scmp.ne.s32.totalorder (!%p137_p3), %s1369_s9, 0 }
  0x10   : > { %s1955_s16 = smov (!%p163_p5, %s1183_s16), 63  ;;  %s1957_s17 = smov (!%p169_p6, %s1185_s17), 3 }
  0x11   : > { %s1184_s18 = sshll.u32 %s1955_s16, 3  ;;  %s1186_s22 = sshll.u32 %s1957_s17, 2  ;;  %v1387_v0 = vmov (!%p1188_p8), 0.0  }
  0x12   : > { %s1443_s21 = scalar_lea.vmem %s1937_s0, %s1184_s18  ;;  %s1448_s25 = scalar_lea.vmem %s1938_s1, %s1186_s22  ;;  %182 = vst [vmem:[#allocation2] sm:$0xff] (!%p1188_p8), %v1387_v0  ;;  %183 = vst [vmem:[#allocation2 + $0x8] sm:$0xff] (!%p1188_p8), %v1387_v0 }
  0x13   : > { %s1959_s10 = smov (!%p174_p7, %s1373_s10), 3  ;;  %181 = sbr.rel (%p1188_p8) target bundleno = 26 (0x1a), region = 32 }
  0x14   : > { %s1187_s26 = sshll.u32 %s1959_s10, 3 }
  0x15   : > { %s1453_s29 = scalar_lea.vmem %s1939_s2, %s1187_s26 }
  0x1a PF: > { %v312_v1 = vld [vmem:[%s1443_s21 + $0x8] sm:$0xff]  ;;  %v187_v2 = vld [vmem:[%s1443_s21] sm:$0xff]  ;;  %v1940_v3 = vmov 3   ;;  %v1941_v4 = vmov 2   ;;  %v1463_v6 = vld [vmem:[%s1443_s21 + $0x38] sm:$0xff]  ;;  %v1390_v7 = vmov 0   ;;  %v194_v24 = vlaneseq }
  0x1b   : > { %1241 = vset.pattern.permute.xlu0 %v1940_v3  ;;  %1237 = vset.pattern.permute.xlu1 %v1941_v4  ;;  %v468_v5 = vld [vmem:[%s1443_s21 + $0x20] sm:$0xff]  ;;  %v1468_v8 = vld [vmem:[%s1443_s21 + $0x50] sm:$0xff]  ;;  %v1391_v10 = vmov 1   ;;  %v1478_v11 = vld [vmem:[%s1443_s21 + $0x68] sm:$0xff]  ;;  %p1189_p9 = scmp.ne.s32.totalorder %s1369_s9, 1 }
  0x1c   : > { %343 = vperm.xlu0 %1241, %v312_v1   ;;  %245 = vperm.xlu1 %1237, %v187_v2   ;;  %v364_v9 = vld [vmem:[%s1443_s21 + $0x10] sm:$0xff]  ;;  %v416_v12 = vld [vmem:[%s1443_s21 + $0x18] sm:$0xff]  ;;  %v520_v13 = vld [vmem:[%s1443_s21 + $0x28] sm:$0xff]  ;;  %v195_v27 = vshrl.u32 %v194_v24, 7 }
  0x1d   : > { %v676_v14 = vld [vmem:[%s1443_s21 + $0x40] sm:$0xff]  ;;  %v572_v15 = vld [vmem:[%s1443_s21 + $0x30] sm:$0xff]  ;;  %v728_v16 = vld [vmem:[%s1443_s21 + $0x48] sm:$0xff] }
  0x1e   : > { %v1502_v17 = vld [vmem:[%s1443_s21 + $0x60] sm:$0xff]  ;;  %v1507_v18 = vld [vmem:[%s1443_s21 + $0x78] sm:$0xff]  ;;  %v196_v29 = vsub.s32 0, %v195_v27  ;;  %v200_v30 = vsub.s32 4, %v195_v27  ;;  %v222_v31 = vsub.s32 1, %v195_v27  ;;  %v226_v32 = vsub.s32 5, %v195_v27 }
  0x1f   : > { %v832_v23 = vld [vmem:[%s1443_s21 + $0x58] sm:$0xff]  ;;  %v184_v34 = vld [vmem:[%s1448_s25] sm:$0xff]  ;;  %v250_v48 = vsub.s32 2, %v195_v27  ;;  %v254_v49 = vsub.s32 6, %v195_v27  ;;  %v278_v50 = vsub.s32 3, %v195_v27  ;;  %v282_v51 = vsub.s32 7, %v195_v27 }
  0x20   : > { %499 = vperm.xlu0 %1241, %v468_v5   ;;  %1238 = vset.pattern.permute.xlu1 %v1940_v3  ;;  %v197_v36 = vrot.slane %v184_v34, %v196_v29  ;;  %v201_v37 = vrot.slane %v184_v34, %v200_v30  ;;  %v223_v38 = vrot.slane %v184_v34, %v222_v31 }
  0x21   : > { %273 = vperm.xlu1 %1238, %v187_v2   ;;  %v227_v39 = vrot.slane %v184_v34, %v226_v32  ;;  %v251_v60 = vrot.slane %v184_v34, %v250_v48  ;;  %v255_v61 = vrot.slane %v184_v34, %v254_v49  ;;  %v279_v62 = vrot.slane %v184_v34, %v278_v50 }
  0x22   : > { %v1551_v42 = vrot.slane %v197_v36, %v196_v29  ;;  %v1553_v43 = vrot.slane %v201_v37, %v196_v29  ;;  %v1556_v44 = vrot.slane %v223_v38, %v222_v31  ;;  %v283_v63 = vrot.slane %v184_v34, %v282_v51 }
  0x23   : > { %v1558_v45 = vrot.slane %v227_v39, %v222_v31 }
  0x24   : > { %655 = vperm.xlu0 %1241, %v1463_v6  }
  0x25   : > { %1239 = vset.pattern.permute.xlu1 %v1390_v7 }
  0x26   : > { %315 = vperm.xlu1 %1239, %v312_v1  }
  0x28   : > { %811 = vperm.xlu0 %1241, %v1468_v8  }
  0x2a   : > { %1240 = vset.pattern.permute.xlu1 %v1941_v4 }
  0x2b   : > { %333 = vperm.xlu1 %1240, %v312_v1  }
  0x2c   : > { %1267 = vset.pattern.permute.xlu0 %v1390_v7 }
  0x2d   : > { %190 = vperm.xlu0 %1267, %v187_v2  }
  0x2f   : > { %1242 = vset.pattern.permute.xlu1 %v1390_v7 }
  0x30   : > { %367 = vperm.xlu1 %1242, %v364_v9  }
  0x31   : > { %471 = vperm.xlu0 %1267, %v468_v5  }
  0x34   : > { %1243 = vset.pattern.permute.xlu1 %v1391_v10 }
  0x35   : > { %627 = vperm.xlu0 %1267, %v1463_v6   ;;  %375 = vperm.xlu1 %1243, %v364_v9  }
  0x39   : > { %939 = vperm.xlu0 %1267, %v1478_v11   ;;  %1244 = vset.pattern.permute.xlu1 %v1940_v3 }
  0x3a   : > { %395 = vperm.xlu1 %1244, %v364_v9  }
  0x3d   : > { %1272 = vset.pattern.permute.xlu0 %v1941_v4 }
  0x3e   : > { %385 = vperm.xlu0 %1272, %v364_v9   ;;  %1245 = vset.pattern.permute.xlu1 %v1390_v7  ;;  %v1575_v9 = vrot.slane %v279_v62, %v278_v50 }
  0x3f   : > { %419 = vperm.xlu1 %1245, %v416_v12  }
  0x42   : > { %541 = vperm.xlu0 %1272, %v520_v13  }
  0x43   : > { %1246 = vset.pattern.permute.xlu1 %v1941_v4 }
  0x44   : > { %437 = vperm.xlu1 %1246, %v416_v12  }
  0x46   : > { %697 = vperm.xlu0 %1272, %v676_v14  }
  0x48   : > { %1247 = vset.pattern.permute.xlu1 %v1940_v3 }
  0x49   : > { %447 = vperm.xlu1 %1247, %v416_v12  }
  0x4a   : > { %801 = vperm.xlu0 %1272, %v1468_v8  }
  0x4d   : > { %1248 = vset.pattern.permute.xlu1 %v1391_v10 }
  0x4e   : > { %957 = vperm.xlu0 %1272, %v1478_v11   ;;  %479 = vperm.xlu1 %1248, %v468_v5  }
  0x52   : > { %1275 = vset.pattern.permute.xlu0 %v1391_v10  ;;  %1249 = vset.pattern.permute.xlu1 %v1941_v4 }
  0x53   : > { %217 = vperm.xlu0 %1275, %v187_v2   ;;  %489 = vperm.xlu1 %1249, %v468_v5  }
  0x57   : > { %323 = vperm.xlu0 %1275, %v312_v1   ;;  %1250 = vset.pattern.permute.xlu1 %v1390_v7 }
  0x58   : > { %523 = vperm.xlu1 %1250, %v520_v13  }
  0x5b   : > { %427 = vperm.xlu0 %1275, %v416_v12   ;;  %v1577_v12 = vrot.slane %v283_v63, %v278_v50 }
  0x5c   : > { %1251 = vset.pattern.permute.xlu1 %v1391_v10 }
  0x5d   : > { %531 = vperm.xlu1 %1251, %v520_v13  }
  0x5f   : > { %583 = vperm.xlu0 %1275, %v572_v15  }
  0x61   : > { %1252 = vset.pattern.permute.xlu1 %v1940_v3 }
  0x62   : > { %551 = vperm.xlu1 %1252, %v520_v13  }
  0x63   : > { %739 = vperm.xlu0 %1275, %v728_v16  }
  0x66   : > { %1253 = vset.pattern.permute.xlu1 %v1390_v7 }
  0x67   : > { %575 = vperm.xlu1 %1253, %v572_v15   ;;  %791 = vperm.xlu0 %1275, %v1468_v8  }
  0x6b   : > { %1254 = vset.pattern.permute.xlu1 %v1941_v4  ;;  %895 = vperm.xlu0 %1275, %v1502_v17  }
  0x6c   : > { %593 = vperm.xlu1 %1254, %v572_v15  }
  0x6f   : > { %1051 = vperm.xlu0 %1275, %v1507_v18  }
  0x70   : > { %1255 = vset.pattern.permute.xlu1 %v1940_v3 }
  0x71   : > { %603 = vperm.xlu1 %1255, %v572_v15  }
  0x73   : > { %1280 = vset.pattern.permute.xlu0 %v1940_v3 }
  0x74   : > { %967 = vperm.xlu0 %1280, %v1478_v11  }
  0x75   : > { %1256 = vset.pattern.permute.xlu1 %v1391_v10 }
  0x76   : > { %635 = vperm.xlu1 %1256, %v1463_v6  }
  0x78   : > { %1071 = vperm.xlu0 %1280, %v1507_v18  }
  0x7a   : > { %1257 = vset.pattern.permute.xlu1 %v1941_v4 }
  0x7b   : > { %645 = vperm.xlu1 %1257, %v1463_v6   ;;  %v1571_v6 = vrot.slane %v251_v60, %v250_v48 }
  0x7f   : > { %1258 = vset.pattern.permute.xlu1 %v1390_v7 }
  0x80   : > { %679 = vperm.xlu1 %1258, %v676_v14  }
  0x84   : > { %1259 = vset.pattern.permute.xlu1 %v1391_v10 }
  0x85   : > { %687 = vperm.xlu1 %1259, %v676_v14  }
  0x89   : > { %1260 = vset.pattern.permute.xlu1 %v1940_v3 }
  0x8a   : > { %707 = vperm.xlu1 %1260, %v676_v14  }
  0x8e   : > { %1261 = vset.pattern.permute.xlu1 %v1390_v7 }
  0x8f   : > { %731 = vperm.xlu1 %1261, %v728_v16  }
  0x93   : > { %1262 = vset.pattern.permute.xlu1 %v1941_v4 }
  0x94   : > { %749 = vperm.xlu1 %1262, %v728_v16  }
  0x98   : > { %1263 = vset.pattern.permute.xlu1 %v1390_v7 }
  0x99   : > { %783 = vperm.xlu1 %1263, %v1468_v8   ;;  %v1573_v8 = vrot.slane %v255_v61, %v250_v48 }
  0x9b   : > { %v1525_v19 = vpop.permute.xlu1 %245  ;;  %v1527_v20 = vpop.permute.xlu0 %343 }
  0x9c   : > { %v266_v38 = vsub.f32 %v1525_v19, %v1571_v6  ;;  %v267_v39 = vsub.f32 %v1525_v19, %v1573_v8 }
  0x9d   : > { %1264 = vset.pattern.permute.xlu1 %v1940_v3 }
  0x9e   : > { %759 = vperm.xlu1 %1264, %v728_v16  }
  0x9f   : > { %v1530_v21 = vpop.permute.xlu0 %499 }
  0xa0   : > { %v1532_v22 = vpop.permute.xlu1 %273  ;;  %v502_v19 = vsub.f32 %v1530_v21, %v1575_v9  ;;  %v503_v51 = vsub.f32 %v1530_v21, %v1577_v12 }
  0xa1   : > { %v294_v49 = vsub.f32 %v1532_v22, %v1575_v9  ;;  %v295_v50 = vsub.f32 %v1532_v22, %v1577_v12 }
  0xa2   : > { %1265 = vset.pattern.permute.xlu1 %v1390_v7  ;;  %v1629_v60 = vmul.f32 %v502_v19, %v502_v19  ;;  %v1631_v61 = vmul.f32 %v503_v51, %v503_v51 }
  0xa3   : > { %835 = vperm.xlu1 %1265, %v832_v23   ;;  %v1536_v25 = vpop.permute.xlu0 %655 }
  0xa5   : > { %v1538_v26 = vpop.permute.xlu1 %315 }
  0xa6   : > { %v318_v22 = vsub.f32 %v1538_v26, %v1551_v42  ;;  %v319_v21 = vsub.f32 %v1538_v26, %v1553_v43 }
  0xa7   : > { %1266 = vset.pattern.permute.xlu1 %v1391_v10  ;;  %v1541_v28 = vpop.permute.xlu0 %811 }
  0xa8   : > { %843 = vperm.xlu1 %1266, %v832_v23  }
  0xaa   : > { %v1543_v33 = vpop.permute.xlu1 %333 }
  0xab   : > { %v336_v62 = vsub.f32 %v1543_v33, %v1571_v6  ;;  %v337_v63 = vsub.f32 %v1543_v33, %v1573_v8 }
  0xac   : > { %1268 = vset.pattern.permute.xlu1 %v1941_v4  ;;  %v1547_v35 = vpop.permute.xlu0 %190 }
  0xad   : > { %853 = vperm.xlu1 %1268, %v832_v23   ;;  %v212_v26 = vsub.f32 %v1547_v35, %v1551_v42 }
  0xaf   : > { %v368_v40 = vpop.permute.xlu1 %367 }
  0xb0   : > { %v1549_v41 = vpop.permute.xlu0 %471  ;;  %v370_v46 = vsub.f32 %v368_v40, %v1551_v42  ;;  %v371_v47 = vsub.f32 %v368_v40, %v1553_v43 }
  0xb1   : > { %1269 = vset.pattern.permute.xlu1 %v1390_v7  ;;  %v475_v33 = vsub.f32 %v1549_v41, %v1553_v43 }
  0xb2   : > { %887 = vperm.xlu1 %1269, %v1502_v17   ;;  %v372_v56 = vmul.f32 %v370_v46, %v370_v46  ;;  %v373_v57 = vmul.f32 %v371_v47, %v371_v47  ;;  %v346_v47 = vsub.f32 %v1527_v20, %v1575_v9 }
  0xb4   : > { %v376_v52 = vpop.permute.xlu1 %375  ;;  %v1563_v53 = vpop.permute.xlu0 %627 }
  0xb5   : > { %v378_v54 = vsub.f32 %v376_v52, %v1556_v44  ;;  %v379_v55 = vsub.f32 %v376_v52, %v1558_v45  ;;  %v1606_v52 = vmul.f32 %v266_v38, %v266_v38 }
  0xb6   : > { %1270 = vset.pattern.permute.xlu1 %v1940_v3 }
  0xb7   : > { %v380_v58 = vmul.f32 %v378_v54, %v378_v54  ;;  %v381_v59 = vmul.f32 %v379_v55, %v379_v55  ;;  %863 = vperm.xlu1 %1270, %v832_v23   ;;  %v1613_v55 = vld [vmem:[%s1443_s21 + $0x70] sm:$0xff] }
  0xb8   : > { %v1568_v0 = vpop.permute.xlu0 %939 }
  0xb9   : > { %v382_v1 = vadd.f32 %v380_v58, %v372_v56  ;;  %v383_v2 = vadd.f32 %v381_v59, %v373_v57  ;;  %v396_v5 = vpop.permute.xlu1 %395  ;;  %v1615_v56 = vmul.f32 %v346_v47, %v346_v47  ;;  %v1627_v59 = vmul.f32 %v295_v50, %v295_v50 }
  0xba   : > { %v398_v14 = vsub.f32 %v396_v5, %v1575_v9  ;;  %v399_v15 = vsub.f32 %v396_v5, %v1577_v12  ;;  %v1649_v5 = vsub.f32 %v1536_v25, %v1577_v12 }
  0xbb   : > { %1271 = vset.pattern.permute.xlu1 %v1941_v4 }
  0xbc   : > { %905 = vperm.xlu1 %1271, %v1502_v17   ;;  %v400_v31 = vmul.f32 %v398_v14, %v398_v14  ;;  %v401_v32 = vmul.f32 %v399_v15, %v399_v15  ;;  %v1655_v14 = vmul.f32 %v318_v22, %v318_v22  ;;  %v1657_v15 = vmul.f32 %v319_v21, %v319_v21 }
  0xbd   : > { %v386_v13 = vpop.permute.xlu0 %385 }
  0xbe   : > { %v388_v16 = vsub.f32 %v386_v13, %v1571_v6  ;;  %v389_v23 = vsub.f32 %v386_v13, %v1573_v8  ;;  %v420_v24 = vpop.permute.xlu1 %419  ;;  %v474_v13 = vsub.f32 %v1549_v41, %v1551_v42  ;;  %v1667_v41 = vmul.f32 %v336_v62, %v336_v62 }
  0xc0   : > { %v390_v27 = vmul.f32 %v388_v16, %v388_v16  ;;  %v391_v29 = vmul.f32 %v389_v23, %v389_v23  ;;  %1273 = vset.pattern.permute.xlu1 %v1391_v10  ;;  %v423_v16 = vsub.f32 %v420_v24, %v1553_v43 }
  0xc1   : > { %947 = vperm.xlu1 %1273, %v1478_v11   ;;  %v542_v30 = vpop.permute.xlu0 %541  ;;  %v347_v11 = vsub.f32 %v1527_v20, %v1577_v12  ;;  %v1608_v20 = vmul.f32 %v267_v39, %v267_v39  ;;  %v477_v39 = vmul.f32 %v475_v33, %v475_v33 }
  0xc2   : > { %v392_v34 = vadd.f32 %v390_v27, %v382_v1  ;;  %v393_v36 = vadd.f32 %v391_v29, %v383_v2  ;;  %v213_v1 = vsub.f32 %v1547_v35, %v1553_v43  ;;  %v1645_v2 = vsub.f32 %v1536_v25, %v1575_v9 }
  0xc3   : > { %v438_v37 = vpop.permute.xlu1 %437  ;;  %v1617_v57 = vmul.f32 %v347_v11, %v347_v11  ;;  %v422_v35 = vsub.f32 %v420_v24, %v1551_v42  ;;  %v544_v25 = vsub.f32 %v542_v30, %v1571_v6  ;;  %v545_v29 = vsub.f32 %v542_v30, %v1573_v8 }
  0xc4   : > { %v402_v40 = vadd.f32 %v400_v31, %v392_v34  ;;  %v403_v46 = vadd.f32 %v401_v32, %v393_v36  ;;  %v1669_v34 = vmul.f32 %v337_v63, %v337_v63  ;;  %v214_v36 = vmul.f32 %v212_v26, %v212_v26 }
  0xc5   : > { %1274 = vset.pattern.permute.xlu1 %v1940_v3  ;;  %v1595_v48 = vpop.permute.xlu0 %697  ;;  %v215_v38 = vmul.f32 %v213_v1, %v213_v1  ;;  %v476_v24 = vmul.f32 %v474_v13, %v474_v13  ;;  %v440_v47 = vsub.f32 %v438_v37, %v1571_v6  ;;  %v441_v11 = vsub.f32 %v438_v37, %v1573_v8 }
  0xc6   : > { %915 = vperm.xlu1 %1274, %v1502_v17   ;;  %v1625_v17 = vmul.f32 %v294_v49, %v294_v49  ;;  %v1677_v30 = vsub.f32 %v1563_v53, %v1551_v42  ;;  %v1679_v49 = vmul.f32 %v422_v35, %v422_v35  ;;  %v1681_v50 = vmul.f32 %v423_v16, %v423_v16 }
  0xc7   : > { %v1683_v51 = vadd.f32 1.0, %v402_v40  ;;  %v1687_v22 = vmul.f32 %v545_v29, %v545_v29  ;;  %v1689_v63 = vadd.f32 1.0, %v403_v46  ;;  %v1694_v33 = vmul.f32 %v440_v47, %v440_v47 }
  0xc8   : > { %v1610_v54 = vpop.permute.xlu1 %447  ;;  %v1696_v35 = vmul.f32 %v441_v11, %v441_v11 }
  0xc9   : > { %v1623_v58 = vpop.permute.xlu0 %801  ;;  %v450_v40 = vsub.f32 %v1610_v54, %v1575_v9  ;;  %1283 = vrcp.f32 %v1683_v51 }
  0xca   : > { %1276 = vset.pattern.permute.xlu1 %v1390_v7  ;;  %1285 = vrcp.f32 %v1689_v63 }
  0xcb   : > { %991 = vperm.xlu1 %1276, %v1613_v55  }
  0xcd   : > { %v480_v23 = vpop.permute.xlu1 %479  ;;  %v1661_v27 = vpop.permute.xlu0 %957 }
  0xce   : > { %v482_v31 = vsub.f32 %v480_v23, %v1556_v44  ;;  %v483_v32 = vsub.f32 %v480_v23, %v1558_v45 }
  0xcf   : > { %1277 = vset.pattern.permute.xlu1 %v1391_v10  ;;  %v1685_v10 = vmul.f32 %v544_v25, %v544_v25 }
  0xd0   : > { %999 = vperm.xlu1 %1277, %v1613_v55   ;;  %v484_v19 = vmul.f32 %v482_v31, %v482_v31  ;;  %v485_v21 = vmul.f32 %v483_v32, %v483_v32  ;;  %v451_v31 = vsub.f32 %v1610_v54, %v1577_v12 }
  0xd2   : > { %v218_v62 = vpop.permute.xlu0 %217  ;;  %v490_v37 = vpop.permute.xlu1 %489  ;;  %v486_v23 = vadd.f32 %v484_v19, %v476_v24  ;;  %v487_v32 = vadd.f32 %v485_v21, %v477_v39  ;;  %v1707_v24 = vmul.f32 %v450_v40, %v450_v40 }
  0xd3   : > { %v238_v26 = vsub.f32 %v218_v62, %v1556_v44  ;;  %v239_v1 = vsub.f32 %v218_v62, %v1558_v45  ;;  %v492_v13 = vsub.f32 %v490_v37, %v1571_v6  ;;  %v493_v16 = vsub.f32 %v490_v37, %v1573_v8 }
  0xd4   : > { %1278 = vset.pattern.permute.xlu1 %v1941_v4 }
  0xd5   : > { %v240_v46 = vmul.f32 %v238_v26, %v238_v26  ;;  %v241_v25 = vmul.f32 %v239_v1, %v239_v1  ;;  %v494_v29 = vmul.f32 %v492_v13, %v492_v13  ;;  %1009 = vperm.xlu1 %1278, %v1613_v55   ;;  %v495_v47 = vmul.f32 %v493_v16, %v493_v16 }
  0xd6   : > { %v324_v11 = vpop.permute.xlu0 %323 }
  0xd7   : > { %v242_v62 = vadd.f32 %v240_v46, %v214_v36  ;;  %v243_v37 = vadd.f32 %v241_v25, %v215_v38  ;;  %v496_v3 = vadd.f32 %v494_v29, %v486_v23  ;;  %v524_v4 = vpop.permute.xlu1 %523  ;;  %v497_v19 = vadd.f32 %v495_v47, %v487_v32 }
  0xd8   : > { %v326_v26 = vsub.f32 %v324_v11, %v1556_v44  ;;  %v327_v1 = vsub.f32 %v324_v11, %v1558_v45  ;;  %v526_v21 = vsub.f32 %v524_v4, %v1551_v42  ;;  %v453_v36 = vmul.f32 %v451_v31, %v451_v31 }
  0xd9   : > { %v270_v13 = vadd.f32 %v1606_v52, %v242_v62  ;;  %v271_v54 = vadd.f32 %v1608_v20, %v243_v37  ;;  %v506_v39 = vadd.f32 %v1629_v60, %v496_v3  ;;  %1279 = vset.pattern.permute.xlu1 %v1390_v7  ;;  %v507_v38 = vadd.f32 %v1631_v61, %v497_v19  ;;  %v1742_v37 = vpop.eup %1283 }
  0xda   : > { %v328_v40 = vmul.f32 %v326_v26, %v326_v26  ;;  %v329_v16 = vmul.f32 %v327_v1, %v327_v1  ;;  %v428_v23 = vpop.permute.xlu0 %427  ;;  %1043 = vperm.xlu1 %1279, %v1507_v18   ;;  %v527_v3 = vsub.f32 %v524_v4, %v1553_v43  ;;  %v528_v61 = vmul.f32 %v526_v21, %v526_v21  ;;  %v1747_v26 = vpop.eup %1285 }
  0xdb   : > { %v298_v46 = vadd.f32 %v1625_v17, %v270_v13  ;;  %v299_v52 = vadd.f32 %v1627_v59, %v271_v54  ;;  %v1720_v25 = vadd.f32 1.0, %v506_v39  ;;  %v1723_v20 = vadd.f32 1.0, %v507_v38 }
  0xdc   : > { %v330_v7 = vadd.f32 %v328_v40, %v1655_v14  ;;  %v331_v60 = vadd.f32 %v329_v16, %v1657_v15  ;;  %v532_v29 = vpop.permute.xlu1 %531  ;;  %v430_v17 = vsub.f32 %v428_v23, %v1556_v44  ;;  %v431_v14 = vsub.f32 %v428_v23, %v1558_v45 }
  0xdd   : > { %v1727_v31 = vadd.f32 1.0, %v298_v46  ;;  %v1729_v32 = vadd.f32 1.0, %v299_v52  ;;  %1287 = vrcp.f32 %v1720_v25  ;;  %v1942_v47 = vmov 3  }
  0xde   : > { %1289 = vrcp.f32 %v1723_v20  ;;  %v340_v4 = vadd.f32 %v1667_v41, %v330_v7  ;;  %v341_v59 = vadd.f32 %v1669_v34, %v331_v60  ;;  %1281 = vset.pattern.permute.xlu1 %v1942_v47  ;;  %v432_v15 = vmul.f32 %v430_v17, %v430_v17 }
  0xdf   : > { %1291 = vrcp.f32 %v1727_v31  ;;  %v534_v11 = vsub.f32 %v532_v29, %v1556_v44  ;;  %v535_v62 = vsub.f32 %v532_v29, %v1558_v45  ;;  %1019 = vperm.xlu1 %1281, %v1613_v55   ;;  %v433_v19 = vmul.f32 %v431_v14, %v431_v14 }
  0xe0   : > { %1293 = vrcp.f32 %v1729_v32  ;;  %v350_v41 = vadd.f32 %v1615_v56, %v340_v4  ;;  %v351_v34 = vadd.f32 %v1617_v57, %v341_v59  ;;  %v529_v1 = vmul.f32 %v527_v3, %v527_v3 }
  0xe1   : > { %v434_v13 = vadd.f32 %v432_v15, %v1679_v49  ;;  %v536_v54 = vmul.f32 %v534_v11, %v534_v11  ;;  %v537_v39 = vmul.f32 %v535_v62, %v535_v62  ;;  %v552_v21 = vpop.permute.xlu1 %551  ;;  %v435_v40 = vadd.f32 %v433_v19, %v1681_v50  ;;  %v584_v50 = vpop.permute.xlu0 %583 }
  0xe2   : > { %v1750_v38 = vadd.f32 1.0, %v350_v41  ;;  %v1752_v55 = vadd.f32 1.0, %v351_v34  ;;  %v554_v16 = vsub.f32 %v552_v21, %v1575_v9  ;;  %v555_v46 = vsub.f32 %v552_v21, %v1577_v12 }
  0xe3   : > { %v444_v56 = vadd.f32 %v1694_v33, %v434_v13  ;;  %v538_v57 = vadd.f32 %v536_v54, %v528_v61  ;;  %v539_v23 = vadd.f32 %v537_v39, %v529_v1  ;;  %v1943_v52 = vmov 2  }
  0xe4   : > { %1282 = vset.pattern.permute.xlu1 %v1943_v52  ;;  %v408_v49 = vmul.f32 %v1742_v37, %v1683_v51  ;;  %1295 = vrcp.f32 %v1750_v38  ;;  %v445_v3 = vadd.f32 %v1696_v35, %v435_v40  ;;  %v556_v7 = vmul.f32 %v554_v16, %v554_v16 }
  0xe5   : > { %1061 = vperm.xlu1 %1282, %v1507_v18   ;;  %1297 = vrcp.f32 %v1752_v55  ;;  %v454_v33 = vadd.f32 %v1707_v24, %v444_v56  ;;  %v548_v60 = vadd.f32 %v1685_v10, %v538_v57  ;;  %v549_v61 = vadd.f32 %v1687_v22, %v539_v23 }
  0xe6   : > { %v631_v29 = vsub.f32 %v1563_v53, %v1553_v43  ;;  %v1772_v51 = vmul.f32 %v1677_v30, %v1677_v30  ;;  %v455_v35 = vadd.f32 %v453_v36, %v445_v3  ;;  %v557_v17 = vmul.f32 %v555_v46, %v555_v46  ;;  %v576_v4 = vpop.permute.xlu1 %575 }
  0xe7   : > { %v1288_v18 = vpop.eup %1287  ;;  %v1774_v59 = vadd.f32 1.0, %v454_v33  ;;  %v558_v14 = vadd.f32 %v556_v7, %v548_v60  ;;  %v586_v24 = vsub.f32 %v584_v50, %v1556_v44  ;;  %v578_v10 = vsub.f32 %v576_v4, %v1551_v42 }
  0xe8   : > { %v1778_v47 = vpop.eup %1289  ;;  %v1780_v22 = vadd.f32 1.0, %v455_v35  ;;  %v559_v53 = vadd.f32 %v557_v17, %v549_v61  ;;  %v587_v15 = vsub.f32 %v584_v50, %v1558_v45  ;;  %v579_v30 = vsub.f32 %v576_v4, %v1553_v43 }
  0xe9   : > { %v1292_v36 = vpop.eup %1291  ;;  %v409_v11 = vmul.f32 %v1747_v26, %v1689_v63  ;;  %v410_v62 = vsub.f32 2.0, %v408_v49  ;;  %1299 = vrcp.f32 %v1774_v59  ;;  %v1787_v41 = vadd.f32 1.0, %v558_v14 }
  0xea   : > { %v1294_v34 = vpop.eup %1293  ;;  %v304_v19 = vmul.f32 %v1292_v36, %v1727_v31  ;;  %v512_v1 = vmul.f32 %v1288_v18, %v1720_v25  ;;  %1301 = vrcp.f32 %v1780_v22  ;;  %v561_v13 = vadd.f32 1.0, %v559_v53 }
  0xeb   : > { %v305_v54 = vmul.f32 %v1294_v34, %v1729_v32  ;;  %1303 = vrcp.f32 %v1787_v41  ;;  %v588_v39 = vmul.f32 %v586_v24, %v586_v24  ;;  %v580_v21 = vmul.f32 %v578_v10, %v578_v10  ;;  %v594_v63 = vpop.permute.xlu1 %593  ;;  %v186_v24 = vld [vmem:[#allocation2 + $0x8] sm:$0xff] }
  0xec   : > { %v306_v40 = vsub.f32 2.0, %v304_v19  ;;  %1305 = vrcp.f32 %v561_v13  ;;  %v589_v16 = vmul.f32 %v587_v15, %v587_v15  ;;  %v581_v56 = vmul.f32 %v579_v30, %v579_v30 }
  0xed   : > { %v1794_v57 = vmul.f32 %v631_v29, %v631_v29  ;;  %v307_v23 = vsub.f32 2.0, %v305_v54  ;;  %v513_v25 = vmul.f32 %v1778_v47, %v1723_v20  ;;  %v596_v31 = vsub.f32 %v594_v63, %v1571_v6  ;;  %v185_v29 = vld [vmem:[#allocation2] sm:$0xff] }
  0xee   : > { %v1296_v46 = vpop.eup %1295  ;;  %v411_v52 = vsub.f32 2.0, %v409_v11  ;;  %v412_v32 = vmul.f32 %v1742_v37, %v410_v62  ;;  %v514_v49 = vsub.f32 2.0, %v512_v1  ;;  %v597_v3 = vsub.f32 %v594_v63, %v1573_v8 }
  0xef   : > { %v1298_v7 = vpop.eup %1297  ;;  %v308_v50 = vmul.f32 %v1292_v36, %v306_v40  ;;  %v356_v33 = vmul.f32 %v1296_v46, %v1750_v38  ;;  %v590_v60 = vadd.f32 %v588_v39, %v580_v21  ;;  %v598_v61 = vmul.f32 %v596_v31, %v596_v31 }
  0xf0   : > { %v309_v35 = vmul.f32 %v1294_v34, %v307_v23  ;;  %v357_v17 = vmul.f32 %v1298_v7, %v1752_v55  ;;  %v591_v20 = vadd.f32 %v589_v16, %v581_v56  ;;  %v599_v4 = vmul.f32 %v597_v3, %v597_v3  ;;  %v604_v14 = vpop.permute.xlu1 %603 }
  0xf1   : > { %v515_v10 = vsub.f32 2.0, %v513_v25  ;;  %v358_v53 = vsub.f32 2.0, %v356_v33  ;;  %v600_v37 = vadd.f32 %v598_v61, %v590_v60  ;;  %v606_v15 = vsub.f32 %v604_v14, %v1575_v9 }
  0xf2   : > { %v413_v30 = vmul.f32 %v1747_v26, %v411_v52  ;;  %v359_v36 = vsub.f32 2.0, %v357_v17  ;;  %v601_v11 = vadd.f32 %v599_v4, %v591_v20  ;;  %v607_v38 = vsub.f32 %v604_v14, %v1577_v12 }
  0xf3   : > { %v1300_v62 = vpop.eup %1299  ;;  %v310_v19 = vadd.f32 %v308_v50, %v185_v29  ;;  %v516_v34 = vmul.f32 %v1288_v18, %v514_v49  ;;  %v360_v1 = vmul.f32 %v1296_v46, %v358_v53  ;;  %v608_v55 = vmul.f32 %v606_v15, %v606_v15 }
  0xf4   : > { %v1302_v54 = vpop.eup %1301  ;;  %v311_v39 = vadd.f32 %v309_v35, %v186_v24  ;;  %v361_v21 = vmul.f32 %v1298_v7, %v359_v36  ;;  %v460_v63 = vmul.f32 %v1300_v62, %v1774_v59  ;;  %v609_v40 = vmul.f32 %v607_v38, %v607_v38 }
  0xf5   : > { %v1304_v16 = vpop.eup %1303  ;;  %v517_v56 = vmul.f32 %v1778_v47, %v515_v10  ;;  %v362_v23 = vadd.f32 %v360_v1, %v310_v19  ;;  %v461_v26 = vmul.f32 %v1302_v54, %v1780_v22  ;;  %v610_v25 = vadd.f32 %v608_v55, %v600_v37  ;;  %v636_v31 = vpop.permute.xlu1 %635 }
  0xf6   : > { %v1306_v52 = vpop.eup %1305  ;;  %v363_v3 = vadd.f32 %v361_v21, %v311_v39  ;;  %v462_v50 = vsub.f32 2.0, %v460_v63  ;;  %v564_v18 = vmul.f32 %v1304_v16, %v1787_v41  ;;  %v611_v46 = vadd.f32 %v609_v40, %v601_v11 }
  0xf7   : > { %v463_v49 = vsub.f32 2.0, %v461_v26  ;;  %v414_v33 = vadd.f32 %v412_v32, %v362_v23  ;;  %v565_v7 = vmul.f32 %v1306_v52, %v561_v13  ;;  %v612_v60 = vadd.f32 1.0, %v610_v25 }
  0xf8   : > { %v464_v59 = vmul.f32 %v1300_v62, %v462_v50  ;;  %v415_v61 = vadd.f32 %v413_v30, %v363_v3  ;;  %v566_v29 = vsub.f32 2.0, %v564_v18  ;;  %v613_v35 = vadd.f32 1.0, %v611_v46 }
  0xf9   : > { %v465_v47 = vmul.f32 %v1302_v54, %v463_v49  ;;  %v567_v17 = vsub.f32 2.0, %v565_v7  ;;  %1307 = vrcp.f32 %v612_v60  ;;  %v638_v22 = vsub.f32 %v636_v31, %v1556_v44 }
  0xfa   : > { %v466_v20 = vadd.f32 %v464_v59, %v414_v33  ;;  %v568_v4 = vmul.f32 %v1304_v16, %v566_v29  ;;  %1309 = vrcp.f32 %v613_v35  ;;  %v639_v14 = vsub.f32 %v636_v31, %v1558_v45  ;;  %v646_v41 = vpop.permute.xlu1 %645 }
  0xfb   : > { %v467_v24 = vadd.f32 %v465_v47, %v415_v61  ;;  %v569_v10 = vmul.f32 %v1306_v52, %v567_v17  ;;  %v640_v32 = vmul.f32 %v638_v22, %v638_v22  ;;  %v648_v13 = vsub.f32 %v646_v41, %v1571_v6 }
  0xfc   : > { %v518_v53 = vadd.f32 %v516_v34, %v466_v20  ;;  %v641_v37 = vmul.f32 %v639_v14, %v639_v14  ;;  %v649_v15 = vsub.f32 %v646_v41, %v1573_v8  ;;  %v660_v30 = vmul.f32 %v1645_v2, %v1645_v2 }
  0xfd   : > { %v519_v36 = vadd.f32 %v517_v56, %v467_v24  ;;  %v642_v11 = vadd.f32 %v640_v32, %v1772_v51  ;;  %v650_v38 = vmul.f32 %v648_v13, %v648_v13  ;;  %v661_v62 = vmul.f32 %v1649_v5, %v1649_v5  ;;  %v740_v13 = vpop.permute.xlu0 %739 }
  0xfe   : > { %v570_v19 = vadd.f32 %v568_v4, %v518_v53  ;;  %v643_v1 = vadd.f32 %v641_v37, %v1794_v57  ;;  %v651_v55 = vmul.f32 %v649_v15, %v649_v15  ;;  %v700_v21 = vsub.f32 %v1595_v48, %v1571_v6 }
  0xff   : > { %v571_v54 = vadd.f32 %v569_v10, %v519_v36  ;;  %v652_v39 = vadd.f32 %v650_v38, %v642_v11  ;;  %v680_v34 = vpop.permute.xlu1 %679  ;;  %v701_v2 = vsub.f32 %v1595_v48, %v1573_v8 }
 0x100   : > { %v653_v63 = vadd.f32 %v651_v55, %v643_v1  ;;  %v682_v16 = vsub.f32 %v680_v34, %v1551_v42  ;;  %v683_v23 = vsub.f32 %v680_v34, %v1553_v43  ;;  %v702_v26 = vmul.f32 %v700_v21, %v700_v21 }
 0x101   : > { %v662_v40 = vadd.f32 %v660_v30, %v652_v39  ;;  %v703_v46 = vmul.f32 %v701_v2, %v701_v2  ;;  %v742_v21 = vsub.f32 %v740_v13, %v1556_v44 }
 0x102   : > { %v663_v51 = vadd.f32 %v661_v62, %v653_v63  ;;  %v684_v49 = vmul.f32 %v682_v16, %v682_v16  ;;  %v685_v7 = vmul.f32 %v683_v23, %v683_v23  ;;  %v804_v16 = vsub.f32 %v1623_v58, %v1571_v6 }
 0x103   : > { %v1308_v56 = vpop.eup %1307  ;;  %v664_v5 = vadd.f32 1.0, %v662_v40 }
 0x104   : > { %v1310_v57 = vpop.eup %1309  ;;  %v616_v25 = vmul.f32 %v1308_v56, %v612_v60  ;;  %v665_v31 = vadd.f32 1.0, %v663_v51  ;;  %v688_v52 = vpop.permute.xlu1 %687 }
 0x105   : > { %v617_v3 = vmul.f32 %v1310_v57, %v613_v35  ;;  %1311 = vrcp.f32 %v664_v5  ;;  %v690_v50 = vsub.f32 %v688_v52, %v1556_v44  ;;  %v691_v18 = vsub.f32 %v688_v52, %v1558_v45 }
 0x106   : > { %v618_v48 = vsub.f32 2.0, %v616_v25  ;;  %1313 = vrcp.f32 %v665_v31  ;;  %v815_v52 = vsub.f32 %v1541_v28, %v1577_v12 }
 0x107   : > { %v619_v33 = vsub.f32 2.0, %v617_v3  ;;  %v692_v59 = vmul.f32 %v690_v50, %v690_v50  ;;  %v693_v61 = vmul.f32 %v691_v18, %v691_v18  ;;  %v744_v3 = vmul.f32 %v742_v21, %v742_v21 }
 0x108   : > { %v620_v29 = vmul.f32 %v1308_v56, %v618_v48 }
 0x109   : > { %v621_v47 = vmul.f32 %v1310_v57, %v619_v33  ;;  %v694_v17 = vadd.f32 %v692_v59, %v684_v49  ;;  %v695_v60 = vadd.f32 %v693_v61, %v685_v7  ;;  %v708_v22 = vpop.permute.xlu1 %707  ;;  %v814_v57 = vsub.f32 %v1541_v28, %v1575_v9 }
 0x10a   : > { %v622_v20 = vadd.f32 %v620_v29, %v570_v19  ;;  %v710_v35 = vsub.f32 %v708_v22, %v1575_v9  ;;  %v711_v4 = vsub.f32 %v708_v22, %v1577_v12  ;;  %v792_v19 = vpop.permute.xlu0 %791  ;;  %v806_v59 = vmul.f32 %v804_v16, %v804_v16 }
 0x10b   : > { %v623_v14 = vadd.f32 %v621_v47, %v571_v54  ;;  %v704_v41 = vadd.f32 %v702_v26, %v694_v17  ;;  %v705_v24 = vadd.f32 %v703_v46, %v695_v60  ;;  %v794_v63 = vsub.f32 %v792_v19, %v1556_v44 }
 0x10c   : > { %v712_v10 = vmul.f32 %v710_v35, %v710_v35  ;;  %v713_v32 = vmul.f32 %v711_v4, %v711_v4  ;;  %v795_v51 = vsub.f32 %v792_v19, %v1558_v45  ;;  %v805_v26 = vsub.f32 %v1623_v58, %v1573_v8 }
 0x10d   : > { %v796_v18 = vmul.f32 %v794_v63, %v794_v63  ;;  %v816_v28 = vmul.f32 %v814_v57, %v814_v57 }
 0x10e   : > { %v714_v53 = vadd.f32 %v712_v10, %v704_v41  ;;  %v715_v37 = vadd.f32 %v713_v32, %v705_v24  ;;  %v732_v15 = vpop.permute.xlu1 %731  ;;  %v797_v49 = vmul.f32 %v795_v51, %v795_v51  ;;  %v807_v29 = vmul.f32 %v805_v26, %v805_v26 }
 0x10f   : > { %v1312_v30 = vpop.eup %1311  ;;  %v734_v2 = vsub.f32 %v732_v15, %v1551_v42  ;;  %v735_v23 = vsub.f32 %v732_v15, %v1553_v43 }
 0x110   : > { %v1314_v36 = vpop.eup %1313  ;;  %v668_v11 = vmul.f32 %v1312_v30, %v664_v5  ;;  %v716_v38 = vadd.f32 1.0, %v714_v53  ;;  %v717_v62 = vadd.f32 1.0, %v715_v37  ;;  %v743_v5 = vsub.f32 %v740_v13, %v1558_v45 }
 0x111   : > { %v669_v1 = vmul.f32 %v1314_v36, %v665_v31  ;;  %v736_v48 = vmul.f32 %v734_v2, %v734_v2  ;;  %v737_v58 = vmul.f32 %v735_v23, %v735_v23 }
 0x112   : > { %v670_v55 = vsub.f32 2.0, %v668_v11  ;;  %1315 = vrcp.f32 %v716_v38  ;;  %v745_v61 = vmul.f32 %v743_v5, %v743_v5 }
 0x113   : > { %v671_v39 = vsub.f32 2.0, %v669_v1  ;;  %1317 = vrcp.f32 %v717_v62  ;;  %v750_v54 = vpop.permute.xlu1 %749  ;;  %v746_v41 = vadd.f32 %v744_v3, %v736_v48 }
 0x114   : > { %v672_v34 = vmul.f32 %v1312_v30, %v670_v55  ;;  %v752_v31 = vsub.f32 %v750_v54, %v1571_v6  ;;  %v753_v50 = vsub.f32 %v750_v54, %v1573_v8  ;;  %v747_v53 = vadd.f32 %v745_v61, %v737_v58 }
 0x115   : > { %v673_v40 = vmul.f32 %v1314_v36, %v671_v39 }
 0x116   : > { %v674_v56 = vadd.f32 %v672_v34, %v622_v20  ;;  %v754_v47 = vmul.f32 %v752_v31, %v752_v31  ;;  %v817_v20 = vmul.f32 %v815_v52, %v815_v52  ;;  %v755_v35 = vmul.f32 %v753_v50, %v753_v50 }
 0x117   : > { %v675_v25 = vadd.f32 %v673_v40, %v623_v14 }
 0x118   : > { %v784_v46 = vpop.permute.xlu1 %783  ;;  %v756_v36 = vadd.f32 %v754_v47, %v746_v41  ;;  %v757_v55 = vadd.f32 %v755_v35, %v747_v53 }
 0x119   : > { %v786_v33 = vsub.f32 %v784_v46, %v1551_v42  ;;  %v787_v7 = vsub.f32 %v784_v46, %v1553_v43 }
 0x11b   : > { %v788_v17 = vmul.f32 %v786_v33, %v786_v33  ;;  %v789_v60 = vmul.f32 %v787_v7, %v787_v7 }
 0x11c   : > { %v1316_v22 = vpop.eup %1315 }
 0x11d   : > { %v1318_v4 = vpop.eup %1317  ;;  %v720_v14 = vmul.f32 %v1316_v22, %v716_v38  ;;  %v798_v24 = vadd.f32 %v796_v18, %v788_v17  ;;  %v799_v10 = vadd.f32 %v797_v49, %v789_v60  ;;  %v760_v32 = vpop.permute.xlu1 %759 }
 0x11e   : > { %v721_v13 = vmul.f32 %v1318_v4, %v717_v62  ;;  %v762_v37 = vsub.f32 %v760_v32, %v1575_v9  ;;  %v763_v15 = vsub.f32 %v760_v32, %v1577_v12  ;;  %v943_v32 = vsub.f32 %v1568_v0, %v1553_v43 }
 0x11f   : > { %v722_v30 = vsub.f32 2.0, %v720_v14  ;;  %v808_v11 = vadd.f32 %v806_v59, %v798_v24  ;;  %v809_v1 = vadd.f32 %v807_v29, %v799_v10  ;;  %v896_v24 = vpop.permute.xlu0 %895  ;;  %v942_v10 = vsub.f32 %v1568_v0, %v1551_v42 }
 0x120   : > { %v723_v19 = vsub.f32 2.0, %v721_v13  ;;  %v764_v39 = vmul.f32 %v762_v37, %v762_v37  ;;  %v765_v54 = vmul.f32 %v763_v15, %v763_v15  ;;  %v898_v37 = vsub.f32 %v896_v24, %v1556_v44 }
 0x121   : > { %v724_v34 = vmul.f32 %v1316_v22, %v722_v30  ;;  %v818_v38 = vadd.f32 %v816_v28, %v808_v11  ;;  %v819_v21 = vadd.f32 %v817_v20, %v809_v1  ;;  %v945_v11 = vmul.f32 %v943_v32, %v943_v32 }
 0x122   : > { %v725_v63 = vmul.f32 %v1318_v4, %v723_v19  ;;  %v766_v40 = vadd.f32 %v764_v39, %v756_v36  ;;  %v767_v2 = vadd.f32 %v765_v54, %v757_v55  ;;  %v836_v62 = vpop.permute.xlu1 %835  ;;  %v944_v36 = vmul.f32 %v942_v10, %v942_v10 }
 0x123   : > { %v726_v51 = vadd.f32 %v724_v34, %v674_v56  ;;  %v820_v16 = vadd.f32 1.0, %v818_v38  ;;  %v821_v5 = vadd.f32 1.0, %v819_v21  ;;  %v838_v53 = vsub.f32 %v836_v62, %v1551_v42  ;;  %v1868_v54 = vpop.permute.xlu0 %1051 }
 0x124   : > { %v727_v23 = vadd.f32 %v725_v63, %v675_v25  ;;  %v768_v57 = vadd.f32 1.0, %v766_v40  ;;  %v769_v26 = vadd.f32 1.0, %v767_v2  ;;  %v960_v1 = vsub.f32 %v1661_v27, %v1571_v6 }
 0x125   : > { %1319 = vrcp.f32 %v820_v16  ;;  %v839_v19 = vsub.f32 %v836_v62, %v1553_v43  ;;  %v899_v0 = vsub.f32 %v896_v24, %v1558_v45  ;;  %v840_v34 = vmul.f32 %v838_v53, %v838_v53 }
 0x126   : > { %1321 = vrcp.f32 %v821_v5  ;;  %v900_v21 = vmul.f32 %v898_v37, %v898_v37 }
 0x127   : > { %1323 = vrcp.f32 %v768_v57  ;;  %v844_v31 = vpop.permute.xlu1 %843 }
 0x128   : > { %1325 = vrcp.f32 %v769_v26  ;;  %v846_v15 = vsub.f32 %v844_v31, %v1556_v44  ;;  %v847_v30 = vsub.f32 %v844_v31, %v1558_v45  ;;  %v841_v31 = vmul.f32 %v839_v19, %v839_v19 }
 0x12a   : > { %v848_v2 = vmul.f32 %v846_v15, %v846_v15 }
 0x12c   : > { %v854_v52 = vpop.permute.xlu1 %853 }
 0x12d   : > { %v856_v55 = vsub.f32 %v854_v52, %v1571_v6  ;;  %v857_v38 = vsub.f32 %v854_v52, %v1573_v8 }
 0x12f   : > { %v1320_v3 = vpop.eup %1319  ;;  %v858_v52 = vmul.f32 %v856_v55, %v856_v55 }
 0x130   : > { %v1322_v50 = vpop.eup %1321  ;;  %v824_v18 = vmul.f32 %v1320_v3, %v820_v16 }
 0x131   : > { %v1324_v46 = vpop.eup %1323  ;;  %v825_v48 = vmul.f32 %v1322_v50, %v821_v5  ;;  %v888_v49 = vpop.permute.xlu1 %887 }
 0x132   : > { %v1326_v33 = vpop.eup %1325  ;;  %v772_v7 = vmul.f32 %v1324_v46, %v768_v57  ;;  %v826_v59 = vsub.f32 2.0, %v824_v18  ;;  %v890_v39 = vsub.f32 %v888_v49, %v1551_v42  ;;  %v891_v63 = vsub.f32 %v888_v49, %v1553_v43 }
 0x133   : > { %v773_v56 = vmul.f32 %v1326_v33, %v769_v26  ;;  %v827_v25 = vsub.f32 2.0, %v825_v48  ;;  %v859_v18 = vmul.f32 %v857_v38, %v857_v38 }
 0x134   : > { %v774_v61 = vsub.f32 2.0, %v772_v7  ;;  %v828_v60 = vmul.f32 %v1320_v3, %v826_v59  ;;  %v892_v3 = vmul.f32 %v890_v39, %v890_v39  ;;  %v893_v48 = vmul.f32 %v891_v63, %v891_v63 }
 0x135   : > { %v775_v58 = vsub.f32 2.0, %v773_v56  ;;  %v829_v28 = vmul.f32 %v1322_v50, %v827_v25  ;;  %v962_v39 = vmul.f32 %v960_v1, %v960_v1 }
 0x136   : > { %v776_v29 = vmul.f32 %v1324_v46, %v774_v61  ;;  %v864_v47 = vpop.permute.xlu1 %863  ;;  %v901_v46 = vmul.f32 %v899_v0, %v899_v0  ;;  %v968_v61 = vpop.permute.xlu0 %967 }
 0x137   : > { %v777_v17 = vmul.f32 %v1326_v33, %v775_v58  ;;  %v866_v16 = vsub.f32 %v864_v47, %v1575_v9  ;;  %v867_v5 = vsub.f32 %v864_v47, %v1577_v12  ;;  %v850_v33 = vadd.f32 %v848_v2, %v840_v34 }
 0x138   : > { %v778_v22 = vadd.f32 %v776_v29, %v726_v51  ;;  %v849_v51 = vmul.f32 %v847_v30, %v847_v30  ;;  %v970_v24 = vsub.f32 %v968_v61, %v1575_v9  ;;  %v971_v53 = vsub.f32 %v968_v61, %v1577_v12 }
 0x139   : > { %v779_v20 = vadd.f32 %v777_v17, %v727_v23  ;;  %v868_v56 = vmul.f32 %v866_v16, %v866_v16  ;;  %v869_v58 = vmul.f32 %v867_v5, %v867_v5 }
 0x13a   : > { %v1850_v35 = vadd.f32 %v828_v60, %v778_v22  ;;  %v851_v7 = vadd.f32 %v849_v51, %v841_v31  ;;  %v961_v60 = vsub.f32 %v1661_v27, %v1573_v8  ;;  %v860_v22 = vadd.f32 %v858_v52, %v850_v33 }
 0x13b   : > { %v1852_v4 = vadd.f32 %v829_v28, %v779_v20  ;;  %v906_v14 = vpop.permute.xlu1 %905  ;;  %v902_v28 = vadd.f32 %v900_v21, %v892_v3  ;;  %v972_v34 = vmul.f32 %v970_v24, %v970_v24  ;;  %v973_v63 = vmul.f32 %v971_v53, %v971_v53 }
 0x13c   : > { %v908_v62 = vsub.f32 %v906_v14, %v1571_v6  ;;  %v909_v23 = vsub.f32 %v906_v14, %v1573_v8  ;;  %v861_v14 = vadd.f32 %v859_v18, %v851_v7  ;;  %v870_v32 = vadd.f32 %v868_v56, %v860_v22 }
 0x13d   : > { %v963_v27 = vmul.f32 %v961_v60, %v961_v60  ;;  %v1054_v52 = vsub.f32 %v1868_v54, %v1556_v44  ;;  %v1055_v7 = vsub.f32 %v1868_v54, %v1558_v45  ;;  %v1072_v60 = vpop.permute.xlu0 %1071 }
 0x13e   : > { %v910_v59 = vmul.f32 %v908_v62, %v908_v62  ;;  %v911_v29 = vmul.f32 %v909_v23, %v909_v23  ;;  %v871_v37 = vadd.f32 %v869_v58, %v861_v14  ;;  %v1884_v21 = vadd.f32 1.0, %v870_v32 }
 0x13f   : > { %v1056_v54 = vmul.f32 %v1054_v52, %v1054_v52 }
 0x140   : > { %v948_v41 = vpop.permute.xlu1 %947  ;;  %v1888_v16 = vadd.f32 1.0, %v871_v37  ;;  %1327 = vrcp.f32 %v1884_v21 }
 0x141   : > { %v950_v57 = vsub.f32 %v948_v41, %v1556_v44  ;;  %v951_v26 = vsub.f32 %v948_v41, %v1558_v45  ;;  %v903_v41 = vadd.f32 %v901_v46, %v893_v48 }
 0x142   : > { %1329 = vrcp.f32 %v1888_v16 }
 0x143   : > { %v952_v47 = vmul.f32 %v950_v57, %v950_v57  ;;  %v953_v17 = vmul.f32 %v951_v26, %v951_v26  ;;  %v913_v15 = vadd.f32 %v911_v29, %v903_v41 }
 0x145   : > { %v916_v13 = vpop.permute.xlu1 %915  ;;  %v954_v30 = vadd.f32 %v952_v47, %v944_v36  ;;  %v955_v19 = vadd.f32 %v953_v17, %v945_v11 }
 0x146   : > { %v918_v50 = vsub.f32 %v916_v13, %v1575_v9  ;;  %v919_v49 = vsub.f32 %v916_v13, %v1577_v12  ;;  %v912_v13 = vadd.f32 %v910_v59, %v902_v28 }
 0x147   : > { %v964_v62 = vadd.f32 %v962_v39, %v954_v30  ;;  %v965_v5 = vadd.f32 %v963_v27, %v955_v19 }
 0x148   : > { %v920_v20 = vmul.f32 %v918_v50, %v918_v50  ;;  %v921_v10 = vmul.f32 %v919_v49, %v919_v49 }
 0x149   : > { %v974_v18 = vadd.f32 %v972_v34, %v964_v62  ;;  %v975_v46 = vadd.f32 %v973_v63, %v965_v5 }
 0x14a   : > { %v992_v40 = vpop.permute.xlu1 %991  ;;  %v922_v0 = vadd.f32 %v920_v20, %v912_v13  ;;  %v923_v38 = vadd.f32 %v921_v10, %v913_v15  ;;  %v1074_v10 = vsub.f32 %v1072_v60, %v1575_v9  ;;  %v1075_v13 = vsub.f32 %v1072_v60, %v1577_v12  ;;  %v1328_v15 = vpop.eup %1327 }
 0x14b   : > { %v994_v36 = vsub.f32 %v992_v40, %v1551_v42  ;;  %v995_v1 = vsub.f32 %v992_v40, %v1553_v43  ;;  %v976_v47 = vadd.f32 1.0, %v974_v18  ;;  %v977_v17 = vadd.f32 1.0, %v975_v46 }
 0x14c   : > { %v1891_v11 = vadd.f32 1.0, %v922_v0  ;;  %v1896_v31 = vadd.f32 1.0, %v923_v38 }
 0x14d   : > { %v996_v48 = vmul.f32 %v994_v36, %v994_v36  ;;  %v997_v40 = vmul.f32 %v995_v1, %v995_v1 }
 0x14e   : > { %1331 = vrcp.f32 %v1891_v11 }
 0x14f   : > { %v1000_v25 = vpop.permute.xlu1 %999  ;;  %1333 = vrcp.f32 %v1896_v31 }
 0x150   : > { %v1002_v2 = vsub.f32 %v1000_v25, %v1556_v44  ;;  %v1003_v51 = vsub.f32 %v1000_v25, %v1558_v45  ;;  %1335 = vrcp.f32 %v976_v47 }
 0x151   : > { %1337 = vrcp.f32 %v977_v17 }
 0x152   : > { %v1004_v3 = vmul.f32 %v1002_v2, %v1002_v2  ;;  %v1005_v50 = vmul.f32 %v1003_v51, %v1003_v51  ;;  %v1077_v2 = vmul.f32 %v1075_v13, %v1075_v13 }
 0x154   : > { %v1010_v55 = vpop.permute.xlu1 %1009  ;;  %v1006_v61 = vadd.f32 %v1004_v3, %v996_v48  ;;  %v1007_v25 = vadd.f32 %v1005_v50, %v997_v40 }
 0x155   : > { %v1012_v23 = vsub.f32 %v1010_v55, %v1571_v6  ;;  %v1013_v57 = vsub.f32 %v1010_v55, %v1573_v8  ;;  %v1330_v55 = vpop.eup %1329 }
 0x157   : > { %v1014_v49 = vmul.f32 %v1012_v23, %v1012_v23  ;;  %v1015_v33 = vmul.f32 %v1013_v57, %v1013_v57 }
 0x158   : > { %v1332_v38 = vpop.eup %1331 }
 0x159   : > { %v1044_v26 = vpop.permute.xlu1 %1043  ;;  %v1016_v22 = vadd.f32 %v1014_v49, %v1006_v61  ;;  %v1017_v28 = vadd.f32 %v1015_v33, %v1007_v25  ;;  %v1334_v63 = vpop.eup %1333  ;;  %v928_v36 = vmul.f32 %v1332_v38, %v1891_v11 }
 0x15a   : > { %v1046_v56 = vsub.f32 %v1044_v26, %v1551_v42  ;;  %v1047_v44 = vsub.f32 %v1044_v26, %v1553_v43  ;;  %v1057_v42 = vmul.f32 %v1055_v7, %v1055_v7  ;;  %v929_v1 = vmul.f32 %v1334_v63, %v1896_v31  ;;  %v1336_v52 = vpop.eup %1335 }
 0x15b   : > { %v1338_v50 = vpop.eup %1337  ;;  %v930_v18 = vsub.f32 2.0, %v928_v36  ;;  %v980_v40 = vmul.f32 %v1336_v52, %v976_v47 }
 0x15c   : > { %v1048_v14 = vmul.f32 %v1046_v56, %v1046_v56  ;;  %v1049_v41 = vmul.f32 %v1047_v44, %v1047_v44  ;;  %v931_v46 = vsub.f32 2.0, %v929_v1  ;;  %v981_v33 = vmul.f32 %v1338_v50, %v977_v17 }
 0x15d   : > { %v932_v11 = vmul.f32 %v1332_v38, %v930_v18 }
 0x15e   : > { %v1020_v59 = vpop.permute.xlu1 %1019  ;;  %v1058_v0 = vadd.f32 %v1056_v54, %v1048_v14  ;;  %v1059_v39 = vadd.f32 %v1057_v42, %v1049_v41  ;;  %v933_v31 = vmul.f32 %v1334_v63, %v931_v46 }
 0x15f   : > { %v1022_v58 = vsub.f32 %v1020_v59, %v1575_v9  ;;  %v1023_v29 = vsub.f32 %v1020_v59, %v1577_v12  ;;  %v1076_v9 = vmul.f32 %v1074_v10, %v1074_v10  ;;  %v982_v59 = vsub.f32 2.0, %v980_v40 }
 0x161   : > { %v1024_v20 = vmul.f32 %v1022_v58, %v1022_v58  ;;  %v1025_v45 = vmul.f32 %v1023_v29, %v1023_v29  ;;  %v983_v58 = vsub.f32 2.0, %v981_v33  ;;  %v984_v47 = vmul.f32 %v1336_v52, %v982_v59 }
 0x163   : > { %v1026_v24 = vadd.f32 %v1024_v20, %v1016_v22  ;;  %v1027_v43 = vadd.f32 %v1025_v45, %v1017_v28  ;;  %v985_v17 = vmul.f32 %v1338_v50, %v983_v58 }
 0x164   : > { %v1062_v32 = vpop.permute.xlu1 %1061 }
 0x165   : > { %v1064_v53 = vsub.f32 %v1062_v32, %v1571_v6  ;;  %v1065_v37 = vsub.f32 %v1062_v32, %v1573_v8  ;;  %v1028_v30 = vadd.f32 1.0, %v1026_v24  ;;  %v1029_v19 = vadd.f32 1.0, %v1027_v43 }
 0x166   : > { %v876_v6 = vmul.f32 %v1328_v15, %v1884_v21  ;;  %v877_v8 = vmul.f32 %v1330_v55, %v1888_v16 }
 0x167   : > { %v1066_v27 = vmul.f32 %v1064_v53, %v1064_v53  ;;  %v1067_v34 = vmul.f32 %v1065_v37, %v1065_v37  ;;  %1339 = vrcp.f32 %v1028_v30 }
 0x168   : > { %1341 = vrcp.f32 %v1029_v19  ;;  %v878_v26 = vsub.f32 2.0, %v876_v6  ;;  %v879_v3 = vsub.f32 2.0, %v877_v8 }
 0x169   : > { %v1068_v12 = vadd.f32 %v1066_v27, %v1058_v0  ;;  %v1069_v51 = vadd.f32 %v1067_v34, %v1059_v39 }
 0x16a   : > { %v880_v21 = vmul.f32 %v1328_v15, %v878_v26  ;;  %v881_v49 = vmul.f32 %v1330_v55, %v879_v3 }
 0x16b   : > { %v1078_v62 = vadd.f32 %v1076_v9, %v1068_v12  ;;  %v1079_v5 = vadd.f32 %v1077_v2, %v1069_v51 }
 0x16c   : > { %v882_v44 = vadd.f32 %v880_v21, %v1850_v35  ;;  %v883_v25 = vadd.f32 %v881_v49, %v1852_v4 }
 0x16d   : > { %v1080_v23 = vadd.f32 1.0, %v1078_v62  ;;  %v1081_v57 = vadd.f32 1.0, %v1079_v5 }
 0x16e   : > { %v934_v60 = vadd.f32 %v932_v11, %v882_v44  ;;  %v935_v28 = vadd.f32 %v933_v31, %v883_v25 }
 0x16f   : > { %1343 = vrcp.f32 %v1080_v23 }
 0x170   : > { %1345 = vrcp.f32 %v1081_v57  ;;  %v986_v42 = vadd.f32 %v984_v47, %v934_v60  ;;  %v987_v43 = vadd.f32 %v985_v17, %v935_v28 }
 0x171   : > { %v1340_v48 = vpop.eup %1339 }
 0x172   : > { %v1342_v16 = vpop.eup %1341  ;;  %v1032_v7 = vmul.f32 %v1340_v48, %v1028_v30 }
 0x173   : > { %v1033_v56 = vmul.f32 %v1342_v16, %v1029_v19 }
 0x174   : > { %v1034_v61 = vsub.f32 2.0, %v1032_v7 }
 0x175   : > { %v1035_v29 = vsub.f32 2.0, %v1033_v56 }
 0x176   : > { %v1036_v45 = vmul.f32 %v1340_v48, %v1034_v61 }
 0x177   : > { %v1037_v14 = vmul.f32 %v1342_v16, %v1035_v29 }
 0x178   : > { %v1038_v10 = vadd.f32 %v1036_v45, %v986_v42 }
 0x179   : > { %v1344_v22 = vpop.eup %1343  ;;  %v1039_v13 = vadd.f32 %v1037_v14, %v987_v43 }
 0x17a   : > { %v1346_v20 = vpop.eup %1345  ;;  %v1084_v54 = vmul.f32 %v1344_v22, %v1080_v23 }
 0x17b   : > { %v1085_v41 = vmul.f32 %v1346_v20, %v1081_v57 }
 0x17c   : > { %v1086_v24 = vsub.f32 2.0, %v1084_v54 }
 0x17d   : > { %v1087_v35 = vsub.f32 2.0, %v1085_v41  ;;  %1097 = sbr.rel (%p1189_p9) target bundleno = 398 (0x18e), region = 36 }
 0x17e   : > { %v1088_v32 = vmul.f32 %v1344_v22, %v1086_v24 }
 0x17f   : > { %v1089_v4 = vmul.f32 %v1346_v20, %v1087_v35 }
 0x180   : > { %v1090_v53 = vadd.f32 %v1088_v32, %v1038_v10 }
 0x181   : > { %v1091_v37 = vadd.f32 %v1089_v4, %v1039_v13 }
 0x182   : > { %1092 = vst [vmem:[#allocation2] sm:$0xff] %v1090_v53 }
 0x183   : > { %1093 = vst [vmem:[#allocation2 + $0x8] sm:$0xff] %v1091_v37 }
 0x189   : > { %v1098_v15 = vld [vmem:[#allocation2] sm:$0xff] }
 0x18a   : > { %v1099_v30 = vld [vmem:[#allocation2 + $0x8] sm:$0xff] }
 0x18b   : > { %v1100_v19 = vadd.f32 %v1099_v30, %v1098_v15 }
 0x18d   : > { %1101 = vst [vmem:[%s1453_s29] sm:$0xff] %v1100_v19 }
 0x18e PF: > { %s12_s13 = sadd.s32 1, %s1385_s13   ;;  %s1944_s9 = smov %s1377_s11 }
 0x18f   : > { %p9_p10 = scmp.ge.s32.totalorder %s12_s13, 10   ;;  %s1945_s10 = smov %s1381_s12 }
 0x190   : > { %s1946_s11 = smov %s1949_s14  ;;  %s1947_s12 = smov %s1953_s15 }
 0x191   :  { %11 = sbr.rel (!%p9_p10) target bundleno = 3 (0x3), region = 69 }

</bundles_post_ra>
